<compile_context>
chip_gen: v7x
topology: tpu7x:2x2x1
jax: 0.10.0
libtpu: 0.0.40
codegen_flags: <defaults>
</compile_context>

<pallas_src>
import jax
import jax.numpy as jnp
from jax import lax
from jax.experimental import pallas as pl
from jax.experimental.pallas import tpu as pltpu

OUT_LANES = 128   # lane-dense output block; the real logit lives in column 0


def lstm_head_kernel(emb_ref, len_ref, wih_ref, whh_ref, b_ref,
                     w1_ref, b1_ref, w2_ref, b2_ref, out_ref,
                     xp_ref, h_ref, c_ref):
    # Block shapes (all static):
    #   emb_ref : (1, Tc*Bt, E) bf16  time chunk of one batch tile, row = t*Bt+j
    #   len_ref : (Bt, 1) int32       lengths (0 for padded batch rows)
    #   wih_ref : (E, 4H)  bf16       fused input->gate weights, order (i,f,o,g)
    #   whh_ref : (H, 4H)  bf16       fused hidden->gate weights
    #   b_ref   : (1, 4H)  f32        fused bias (b_ih + b_hh)
    #   w1/b1   : (H, FC) bf16 / (1, FC) f32
    #   w2/b2   : (FC, OUT_LANES) bf16 / (1, OUT_LANES) f32 (zero past col 0)
    #   out_ref : (Bt, OUT_LANES) f32
    #   xp_ref  : (Tc*Bt, 4H) bf16 scratch: chunk-local hoisted input projection
    #   h_ref/c_ref : (Bt, H) f32 scratch, carried across time chunks
    k = pl.program_id(1)
    nk = pl.num_programs(1)
    Bt = len_ref.shape[0]
    Tc = xp_ref.shape[0] // Bt
    H = whh_ref.shape[0]

    @pl.when(k == 0)
    def _():
        h_ref[...] = jnp.zeros_like(h_ref)
        c_ref[...] = jnp.zeros_like(c_ref)

    # Hoisted input projection for this chunk: one lane-dense
    # (Tc*Bt, E) @ (E, 4H) bf16 MXU matmul (f32 accumulate), off the serial
    # recurrence chain.
    xp_ref[...] = (
        jnp.dot(emb_ref[0], wih_ref[...], preferred_element_type=jnp.float32)
        + b_ref[...]).astype(xp_ref.dtype)

    whh = whh_ref[...]                 # read once per chunk, not per step
    lengths = len_ref[...]             # (Bt, 1) int32
    t0 = k * Tc

    def step(t, carry):
        h, c = carry                   # f32 state (Bt, H)
        row0 = pl.multiple_of(t * Bt, Bt)
        z = (xp_ref[pl.ds(row0, Bt), :].astype(jnp.float32)
             + jnp.dot(h.astype(jnp.bfloat16), whh,
                       preferred_element_type=jnp.float32))
        # Gate order (i, f, o, g): one contiguous sigmoid region + one tanh.
        s = jax.nn.sigmoid(z[:, :3 * H])
        i = s[:, 0 * H:1 * H]
        f = s[:, 1 * H:2 * H]
        o = s[:, 2 * H:3 * H]
        g = jnp.tanh(z[:, 3 * H:4 * H])
        c_new = f * c + i * g
        h_new = o * jnp.tanh(c_new)
        valid = (t0 + t) < lengths     # (Bt,1) -> broadcast over H
        return jnp.where(valid, h_new, h), jnp.where(valid, c_new, c)

    # Full unroll only for short chunks; bounded unroll otherwise so the
    # unrolled live ranges don't push the kernel into a spill-bound regime.
    unroll = True if Tc <= 8 else 4
    h, c = lax.fori_loop(0, Tc, step, (h_ref[...], c_ref[...]), unroll=unroll)
    h_ref[...] = h
    c_ref[...] = c

    @pl.when(k == nk - 1)
    def _():
        # fc1 -> relu -> fc2 (lane-padded) -> sigmoid; unmasked (Bt,128) store.
        z1 = jnp.maximum(
            jnp.dot(h.astype(jnp.bfloat16), w1_ref[...],
                    preferred_element_type=jnp.float32) + b1_ref[...], 0.0)
        z2 = jnp.dot(z1.astype(jnp.bfloat16), w2_ref[...],
                     preferred_element_type=jnp.float32) + b2_ref[...]
        out_ref[...] = jax.nn.sigmoid(z2)


def rnn_forward(text, lengths, params, *, time_chunk=32):
    emb_tab = params["embedding"]
    B, T = text.shape
    E = emb_tab.shape[1]
    H = params["whh"].shape[0]
    FC = params["w1"].shape[1]

    # Batch padded to a 16-row sublane group (bf16 packing); padded rows get
    # length 0 so their state stays frozen at zero inside the kernel.
    Bp = ((B + 15) // 16) * 16
    if Bp >= 32:
        Bp = ((Bp + 31) // 32) * 32
        Bt = Bp // 2          # 2 batch tiles -> 'parallel' axis feeds 2 TCs (v7x)
    else:
        Bt = Bp
    nb = Bp // Bt

    Tc = min(time_chunk, T)
    T_pad = ((T + Tc - 1) // Tc) * Tc
    nk = T_pad // Tc

    # Time-major gather straight out of the bf16 table. All the reordering is
    # done on the tiny int32 token array, so the embedded activations are
    # written to HBM exactly once, already in kernel layout (nb, T_pad*Bt, E).
    text_p = jnp.pad(text.astype(jnp.int32), ((0, Bp - B), (0, T_pad - T)))
    tokens = jnp.transpose(text_p)                                 # (T_pad, Bp)
    tokens = tokens.reshape(T_pad, nb, Bt).transpose(1, 0, 2).reshape(
        nb, T_pad * Bt)
    emb = jnp.take(emb_tab.astype(jnp.bfloat16), tokens, axis=0)   # bf16

    len_p = jnp.pad(lengths.astype(jnp.int32), (0, Bp - B)).reshape(Bp, 1)

    # bf16 MXU operands; biases and elementwise gate math stay f32.
    wih = params["wih"].astype(jnp.bfloat16)
    whh = params["whh"].astype(jnp.bfloat16)
    w1 = params["w1"].astype(jnp.bfloat16)
    # Lane-dense output head: pad fc2 to OUT_LANES columns (col 0 is real).
    w2p = (jnp.zeros((FC, OUT_LANES), jnp.float32)
           .at[:, :1].set(params["w2"]).astype(jnp.bfloat16))
    b2p = jnp.zeros((1, OUT_LANES), jnp.float32).at[:, :1].set(params["b2"])

    cost = pl.CostEstimate(
        flops=(2 * T_pad * Bp * (E + H) * 4 * H
               + 2 * Bp * H * FC + 2 * Bp * FC * OUT_LANES),
        transcendentals=T_pad * Bp * 5 * H + Bp * OUT_LANES,
        bytes_accessed=(2 * (T_pad * Bp * E + (E + H) * 4 * H + H * FC
                             + FC * OUT_LANES)
                        + 4 * (4 * H + FC + OUT_LANES + Bp * OUT_LANES + Bp)),
    )

    def full(shape):
        return pl.BlockSpec(shape, lambda b, k, _s=len(shape): (0,) * _s)

    grid_spec = pltpu.PrefetchScalarGridSpec(
        num_scalar_prefetch=0,
        grid=(nb, nk),
        in_specs=[
            pl.BlockSpec((1, Tc * Bt, E), lambda b, k: (b, k, 0)),   # emb chunk
            pl.BlockSpec((Bt, 1), lambda b, k: (b, 0)),              # lengths
            full((E, 4 * H)),                                        # wih
            full((H, 4 * H)),                                        # whh
            full((1, 4 * H)),                                        # bias
            full((H, FC)),                                           # w1
            full((1, FC)),                                           # b1
            full((FC, OUT_LANES)),                                   # w2 (padded)
            full((1, OUT_LANES)),                                    # b2 (padded)
        ],
        out_specs=pl.BlockSpec((Bt, OUT_LANES), lambda b, k: (b, 0)),
        scratch_shapes=[
            pltpu.VMEM((Tc * Bt, 4 * H), jnp.bfloat16),   # chunk input proj
            pltpu.VMEM((Bt, H), jnp.float32),             # h carry
            pltpu.VMEM((Bt, H), jnp.float32),             # c carry
        ],
    )

    out = pl.pallas_call(
        lstm_head_kernel,
        out_shape=jax.ShapeDtypeStruct((Bp, OUT_LANES), jnp.float32),
        grid_spec=grid_spec,
        compiler_params=pltpu.CompilerParams(
            dimension_semantics=("parallel", "arbitrary"),
            # Explicit scoped-VMEM limit: well above the v5e/v6e/v7x defaults,
            # with headroom below v7x's 64 MiB physical VMEM.
            vmem_limit_bytes=48 * 1024 * 1024,
        ),
        cost_estimate=cost,
    )(emb, len_p, wih, whh, params["b"], w1, params["b1"], w2p, b2p)
    return out[:B, :1]


def rnn_reference(text, lengths, params):
    # Pure-JAX f32 reference mirroring the PyTorch forward semantics
    # (fused gate order (i, f, o, g), matching init_params).
    emb = jnp.take(params["embedding"], text, axis=0)
    B, T, _ = emb.shape
    H = params["whh"].shape[0]
    h = jnp.zeros((B, H), jnp.float32)
    c = jnp.zeros((B, H), jnp.float32)
    for t in range(T):
        z = emb[:, t, :] @ params["wih"] + h @ params["whh"] + params["b"]
        i = jax.nn.sigmoid(z[:, 0 * H:1 * H])
        f = jax.nn.sigmoid(z[:, 1 * H:2 * H])
        o = jax.nn.sigmoid(z[:, 2 * H:3 * H])
        g = jnp.tanh(z[:, 3 * H:4 * H])
        c_new = f * c + i * g
        h_new = o * jnp.tanh(c_new)
        valid = (t < lengths)[:, None]
        h = jnp.where(valid, h_new, h)
        c = jnp.where(valid, c_new, c)
    z1 = jnp.maximum(h @ params["w1"] + params["b1"], 0.0)
    return jax.nn.sigmoid(z1 @ params["w2"] + params["b2"])


def init_params(key, vocab_size, embed_dim, rnn_hidden, fc_hidden):
    ks = jax.random.split(key, 10)
    emb = 0.1 * jax.random.normal(ks[0], (vocab_size, embed_dim), jnp.float32)
    emb = emb.at[0].set(0.0)                                     # padding_idx=0
    k = 1.0 / jnp.sqrt(jnp.float32(rnn_hidden))

    def unif(kk, shape):
        return jax.random.uniform(kk, shape, jnp.float32, -k, k)

    return {
        "embedding": emb,
        # Fused LSTM weights, gate order (i, f, o, g) along the 4H columns
        # (sigmoid gates contiguous, tanh gate last), stored pre-transposed as
        # (in, 4H); bias = b_ih + b_hh.
        "wih": unif(ks[1], (embed_dim, 4 * rnn_hidden)),
        "whh": unif(ks[2], (rnn_hidden, 4 * rnn_hidden)),
        "b": unif(ks[3], (1, 4 * rnn_hidden)) + unif(ks[4], (1, 4 * rnn_hidden)),
        "w1": unif(ks[5], (rnn_hidden, fc_hidden)),
        "b1": unif(ks[6], (1, fc_hidden)),
        "w2": unif(ks[7], (fc_hidden, 1)),
        "b2": unif(ks[8], (1, 1)),
    }


if __name__ == "__main__":
    vocab_size, embed_dim, rnn_hidden, fc_hidden = 50, 20, 64, 64
    B, T = 2, 8

    key = jax.random.PRNGKey(0)
    kp, kt = jax.random.split(key)
    params = init_params(kp, vocab_size, embed_dim, rnn_hidden, fc_hidden)

    text = jax.random.randint(kt, (B, T), 1, vocab_size, dtype=jnp.int32)
    lengths = jnp.array([8, 5], dtype=jnp.int32)
    # zero-pad tokens past each sequence's length (padding_idx = 0)
    tmask = jnp.arange(T)[None, :] < lengths[:, None]
    text = jnp.where(tmask, text, 0)

    out = rnn_forward(text, lengths, params)
    out = jax.block_until_ready(out)

    ref = rnn_reference(text, lengths, params)
    assert out.shape == (B, 1)
    assert bool(jnp.all(jnp.isfinite(out)))
    # bf16 MXU operands vs. f32 reference -> loosened tolerance.
    assert bool(jnp.allclose(out, ref, atol=2e-2, rtol=2e-2))
    print("KERNEL_OK")
</pallas_src>

<mosaic_0001>
module attributes {stable_mosaic.version = 11 : i64} {
  func.func @lstm_head_kernel(%arg0: i32, %arg1: i32, %arg2: memref<1x128x20xbf16, #tpu.memory_space<vmem>>, %arg3: memref<16x1xi32, #tpu.memory_space<vmem>>, %arg4: memref<20x256xbf16, #tpu.memory_space<vmem>>, %arg5: memref<64x256xbf16, #tpu.memory_space<vmem>>, %arg6: memref<1x256xf32, #tpu.memory_space<vmem>>, %arg7: memref<64x64xbf16, #tpu.memory_space<vmem>>, %arg8: memref<1x64xf32, #tpu.memory_space<vmem>>, %arg9: memref<64x128xbf16, #tpu.memory_space<vmem>>, %arg10: memref<1x128xf32, #tpu.memory_space<vmem>>, %arg11: memref<16x128xf32, #tpu.memory_space<vmem>>, %arg12: memref<128x256xbf16, #tpu.memory_space<vmem>>, %arg13: memref<16x64xf32, #tpu.memory_space<vmem>>, %arg14: memref<16x64xf32, #tpu.memory_space<vmem>>) attributes {dimension_semantics = [#tpu.dimension_semantics<parallel>, #tpu.dimension_semantics<arbitrary>], iteration_bounds = array<i64: 1, 1>, scalar_prefetch = 0 : i64, scratch_operands = 3 : i64, tpu.core_type = #tpu.core_type<tc>, window_params = [{transform_indices = @transform_0, window_bounds = array<i64: 1, 128, 20>}, {transform_indices = @transform_1, window_bounds = array<i64: 16, 1>}, {pipeline_mode = #tpu.pipeline_mode<synchronous>, transform_indices = @transform_2, window_bounds = array<i64: 20, 256>}, {pipeline_mode = #tpu.pipeline_mode<synchronous>, transform_indices = @transform_3, window_bounds = array<i64: 64, 256>}, {pipeline_mode = #tpu.pipeline_mode<synchronous>, transform_indices = @transform_4, window_bounds = array<i64: 1, 256>}, {pipeline_mode = #tpu.pipeline_mode<synchronous>, transform_indices = @transform_5, window_bounds = array<i64: 64, 64>}, {pipeline_mode = #tpu.pipeline_mode<synchronous>, transform_indices = @transform_6, window_bounds = array<i64: 1, 64>}, {pipeline_mode = #tpu.pipeline_mode<synchronous>, transform_indices = @transform_7, window_bounds = array<i64: 64, 128>}, {pipeline_mode = #tpu.pipeline_mode<synchronous>, transform_indices = @transform_8, window_bounds = array<i64: 1, 128>}, {transform_indices = @transform_9, window_bounds = array<i64: 16, 128>}]} {
    %c0_i32 = arith.constant 0 : i32
    %0 = arith.cmpi eq, %arg1, %c0_i32 : i32
    %1 = arith.extui %0 : i1 to i32
    %c0_i32_0 = arith.constant 0 : i32
    %2 = arith.cmpi ne, %1, %c0_i32_0 : i32
    scf.if %2 {
      %cst_56 = arith.constant 0.000000e+00 : f32
      %286 = vector.broadcast %cst_56 : f32 to vector<16x64xf32>
      %c0_57 = arith.constant 0 : index
      %c0_58 = arith.constant 0 : index
      %287 = vector.load %arg13[%c0_57, %c0_58] : memref<16x64xf32, #tpu.memory_space<vmem>>, vector<16x64xf32>
      tpu.vector_store %arg13[%c0_57, %c0_58], %286 {strides = array<i32>} : memref<16x64xf32, #tpu.memory_space<vmem>>, vector<16x64xf32>,
      %cst_59 = arith.constant 0.000000e+00 : f32
      %288 = vector.broadcast %cst_59 : f32 to vector<16x64xf32>
      %c0_60 = arith.constant 0 : index
      %c0_61 = arith.constant 0 : index
      %289 = vector.load %arg14[%c0_60, %c0_61] : memref<16x64xf32, #tpu.memory_space<vmem>>, vector<16x64xf32>
      tpu.vector_store %arg14[%c0_60, %c0_61], %288 {strides = array<i32>} : memref<16x64xf32, #tpu.memory_space<vmem>>, vector<16x64xf32>,
    } else {
    }
    %c0 = arith.constant 0 : index
    %c0_1 = arith.constant 0 : index
    %c0_2 = arith.constant 0 : index
    %3 = vector.load %arg2[%c0, %c0_1, %c0_2] : memref<1x128x20xbf16, #tpu.memory_space<vmem>>, vector<1x128x20xbf16>
    %4 = vector.shape_cast %3 : vector<1x128x20xbf16> to vector<128x20xbf16>
    %c0_3 = arith.constant 0 : index
    %c0_4 = arith.constant 0 : index
    %5 = vector.load %arg4[%c0_3, %c0_4] : memref<20x256xbf16, #tpu.memory_space<vmem>>, vector<20x256xbf16>
    %cst = arith.constant dense<0.000000e+00> : vector<128x256xf32>
    %6 = tpu.matmul %4, %5, %cst {dimension_numbers = #tpu.dot_dimension_numbers<[1], [0], [0], [1], [0, 0, 1, 1], [], []>} : vector<128x20xbf16>, vector<20x256xbf16>, vector<128x256xf32> -> vector<128x256xf32>
    %c0_5 = arith.constant 0 : index
    %c0_6 = arith.constant 0 : index
    %7 = vector.load %arg6[%c0_5, %c0_6] : memref<1x256xf32, #tpu.memory_space<vmem>>, vector<1x256xf32>
    %8 = vector.broadcast %7 : vector<1x256xf32> to vector<128x256xf32>
    %9 = arith.addf %6, %8 : vector<128x256xf32>
    %10 = arith.truncf %9 : vector<128x256xf32> to vector<128x256xbf16>
    %c0_7 = arith.constant 0 : index
    %c0_8 = arith.constant 0 : index
    %11 = vector.load %arg12[%c0_7, %c0_8] : memref<128x256xbf16, #tpu.memory_space<vmem>>, vector<128x256xbf16>
    tpu.vector_store %arg12[%c0_7, %c0_8], %10 {strides = array<i32>} : memref<128x256xbf16, #tpu.memory_space<vmem>>, vector<128x256xbf16>,
    %c0_9 = arith.constant 0 : index
    %c0_10 = arith.constant 0 : index
    %12 = vector.load %arg5[%c0_9, %c0_10] : memref<64x256xbf16, #tpu.memory_space<vmem>>, vector<64x256xbf16>
    %c0_11 = arith.constant 0 : index
    %c0_12 = arith.constant 0 : index
    %13 = vector.load %arg3[%c0_11, %c0_12] : memref<16x1xi32, #tpu.memory_space<vmem>>, vector<16x1xi32>
    %c8_i32 = arith.constant 8 : i32
    %14 = arith.muli %arg1, %c8_i32 : i32
    %c0_13 = arith.constant 0 : index
    %c0_14 = arith.constant 0 : index
    %15 = vector.load %arg13[%c0_13, %c0_14] : memref<16x64xf32, #tpu.memory_space<vmem>>, vector<16x64xf32>
    %c0_15 = arith.constant 0 : index
    %c0_16 = arith.constant 0 : index
    %16 = vector.load %arg14[%c0_15, %c0_16] : memref<16x64xf32, #tpu.memory_space<vmem>>, vector<16x64xf32>
    %c0_i32_17 = arith.constant 0 : i32
    %c16_i32 = arith.constant 16 : i32
    %17 = arith.muli %c0_i32_17, %c16_i32 : i32
    %18 = tpu.assume_multiple %17, 16 : i32
    %19 = arith.index_cast %18 : i32 to index
    %c0_18 = arith.constant 0 : index
    %20 = vector.load %arg12[%19, %c0_18] : memref<128x256xbf16, #tpu.memory_space<vmem>>, vector<16x256xbf16>
    %21 = arith.extf %20 : vector<16x256xbf16> to vector<16x256xf32>
    %22 = arith.truncf %15 : vector<16x64xf32> to vector<16x64xbf16>
    %cst_19 = arith.constant dense<0.000000e+00> : vector<16x256xf32>
    %23 = tpu.matmul %22, %12, %cst_19 {dimension_numbers = #tpu.dot_dimension_numbers<[1], [0], [0], [1], [0, 0, 1, 1], [], []>} : vector<16x64xbf16>, vector<64x256xbf16>, vector<16x256xf32> -> vector<16x256xf32>
    %24 = arith.addf %21, %23 : vector<16x256xf32>
    %25 = vector.extract_strided_slice %24 {offsets = [0, 0], sizes = [16, 192], strides = [1, 1]} : vector<16x256xf32> to vector<16x192xf32>
    %26 = arith.negf %25 : vector<16x192xf32>
    %27 = math.exp %26 : vector<16x192xf32>
    %cst_20 = arith.constant 1.000000e+00 : f32
    %28 = vector.broadcast %cst_20 : f32 to vector<16x192xf32>
    %29 = arith.addf %28, %27 : vector<16x192xf32>
    %30 = arith.divf %28, %29 : vector<16x192xf32>
    %31 = vector.extract_strided_slice %30 {offsets = [0, 0], sizes = [16, 64], strides = [1, 1]} : vector<16x192xf32> to vector<16x64xf32>
    %32 = vector.extract_strided_slice %30 {offsets = [0, 64], sizes = [16, 64], strides = [1, 1]} : vector<16x192xf32> to vector<16x64xf32>
    %33 = vector.extract_strided_slice %30 {offsets = [0, 128], sizes = [16, 64], strides = [1, 1]} : vector<16x192xf32> to vector<16x64xf32>
    %34 = vector.extract_strided_slice %24 {offsets = [0, 192], sizes = [16, 64], strides = [1, 1]} : vector<16x256xf32> to vector<16x64xf32>
    %35 = math.tanh %34 : vector<16x64xf32>
    %36 = arith.mulf %32, %16 : vector<16x64xf32>
    %37 = arith.mulf %31, %35 : vector<16x64xf32>
    %38 = arith.addf %36, %37 : vector<16x64xf32>
    %39 = math.tanh %38 : vector<16x64xf32>
    %40 = arith.mulf %33, %39 : vector<16x64xf32>
    %41 = arith.addi %14, %c0_i32_17 : i32
    %42 = vector.broadcast %41 : i32 to vector<16x1xi32>
    %43 = arith.cmpi slt, %42, %13 : vector<16x1xi32>
    %44 = vector.shape_cast %43 : vector<16x1xi1> to vector<16x1xi1>
    %45 = vector.broadcast %44 : vector<16x1xi1> to vector<16x64xi1>
    %46 = arith.select %45, %40, %15 : vector<16x64xi1>, vector<16x64xf32>
    %47 = vector.shape_cast %43 : vector<16x1xi1> to vector<16x1xi1>
    %48 = vector.broadcast %47 : vector<16x1xi1> to vector<16x64xi1>
    %49 = arith.select %48, %38, %16 : vector<16x64xi1>, vector<16x64xf32>
    %c1_i32 = arith.constant 1 : i32
    %c16_i32_21 = arith.constant 16 : i32
    %50 = arith.muli %c1_i32, %c16_i32_21 : i32
    %51 = tpu.assume_multiple %50, 16 : i32
    %52 = arith.index_cast %51 : i32 to index
    %c0_22 = arith.constant 0 : index
    %53 = vector.load %arg12[%52, %c0_22] : memref<128x256xbf16, #tpu.memory_space<vmem>>, vector<16x256xbf16>
    %54 = arith.extf %53 : vector<16x256xbf16> to vector<16x256xf32>
    %55 = arith.truncf %46 : vector<16x64xf32> to vector<16x64xbf16>
    %cst_23 = arith.constant dense<0.000000e+00> : vector<16x256xf32>
    %56 = tpu.matmul %55, %12, %cst_23 {dimension_numbers = #tpu.dot_dimension_numbers<[1], [0], [0], [1], [0, 0, 1, 1], [], []>} : vector<16x64xbf16>, vector<64x256xbf16>, vector<16x256xf32> -> vector<16x256xf32>
    %57 = arith.addf %54, %56 : vector<16x256xf32>
    %58 = vector.extract_strided_slice %57 {offsets = [0, 0], sizes = [16, 192], strides = [1, 1]} : vector<16x256xf32> to vector<16x192xf32>
    %59 = arith.negf %58 : vector<16x192xf32>
    %60 = math.exp %59 : vector<16x192xf32>
    %cst_24 = arith.constant 1.000000e+00 : f32
    %61 = vector.broadcast %cst_24 : f32 to vector<16x192xf32>
    %62 = arith.addf %61, %60 : vector<16x192xf32>
    %63 = arith.divf %61, %62 : vector<16x192xf32>
    %64 = vector.extract_strided_slice %63 {offsets = [0, 0], sizes = [16, 64], strides = [1, 1]} : vector<16x192xf32> to vector<16x64xf32>
    %65 = vector.extract_strided_slice %63 {offsets = [0, 64], sizes = [16, 64], strides = [1, 1]} : vector<16x192xf32> to vector<16x64xf32>
    %66 = vector.extract_strided_slice %63 {offsets = [0, 128], sizes = [16, 64], strides = [1, 1]} : vector<16x192xf32> to vector<16x64xf32>
    %67 = vector.extract_strided_slice %57 {offsets = [0, 192], sizes = [16, 64], strides = [1, 1]} : vector<16x256xf32> to vector<16x64xf32>
    %68 = math.tanh %67 : vector<16x64xf32>
    %69 = arith.mulf %65, %49 : vector<16x64xf32>
    %70 = arith.mulf %64, %68 : vector<16x64xf32>
    %71 = arith.addf %69, %70 : vector<16x64xf32>
    %72 = math.tanh %71 : vector<16x64xf32>
    %73 = arith.mulf %66, %72 : vector<16x64xf32>
    %74 = arith.addi %14, %c1_i32 : i32
    %75 = vector.broadcast %74 : i32 to vector<16x1xi32>
    %76 = arith.cmpi slt, %75, %13 : vector<16x1xi32>
    %77 = vector.shape_cast %76 : vector<16x1xi1> to vector<16x1xi1>
    %78 = vector.broadcast %77 : vector<16x1xi1> to vector<16x64xi1>
    %79 = arith.select %78, %73, %46 : vector<16x64xi1>, vector<16x64xf32>
    %80 = vector.shape_cast %76 : vector<16x1xi1> to vector<16x1xi1>
    %81 = vector.broadcast %80 : vector<16x1xi1> to vector<16x64xi1>
    %82 = arith.select %81, %71, %49 : vector<16x64xi1>, vector<16x64xf32>
    %c2_i32 = arith.constant 2 : i32
    %c16_i32_25 = arith.constant 16 : i32
    %83 = arith.muli %c2_i32, %c16_i32_25 : i32
    %84 = tpu.assume_multiple %83, 16 : i32
    %85 = arith.index_cast %84 : i32 to index
    %c0_26 = arith.constant 0 : index
    %86 = vector.load %arg12[%85, %c0_26] : memref<128x256xbf16, #tpu.memory_space<vmem>>, vector<16x256xbf16>
    %87 = arith.extf %86 : vector<16x256xbf16> to vector<16x256xf32>
    %88 = arith.truncf %79 : vector<16x64xf32> to vector<16x64xbf16>
    %cst_27 = arith.constant dense<0.000000e+00> : vector<16x256xf32>
    %89 = tpu.matmul %88, %12, %cst_27 {dimension_numbers = #tpu.dot_dimension_numbers<[1], [0], [0], [1], [0, 0, 1, 1], [], []>} : vector<16x64xbf16>, vector<64x256xbf16>, vector<16x256xf32> -> vector<16x256xf32>
    %90 = arith.addf %87, %89 : vector<16x256xf32>
    %91 = vector.extract_strided_slice %90 {offsets = [0, 0], sizes = [16, 192], strides = [1, 1]} : vector<16x256xf32> to vector<16x192xf32>
    %92 = arith.negf %91 : vector<16x192xf32>
    %93 = math.exp %92 : vector<16x192xf32>
    %cst_28 = arith.constant 1.000000e+00 : f32
    %94 = vector.broadcast %cst_28 : f32 to vector<16x192xf32>
    %95 = arith.addf %94, %93 : vector<16x192xf32>
    %96 = arith.divf %94, %95 : vector<16x192xf32>
    %97 = vector.extract_strided_slice %96 {offsets = [0, 0], sizes = [16, 64], strides = [1, 1]} : vector<16x192xf32> to vector<16x64xf32>
    %98 = vector.extract_strided_slice %96 {offsets = [0, 64], sizes = [16, 64], strides = [1, 1]} : vector<16x192xf32> to vector<16x64xf32>
    %99 = vector.extract_strided_slice %96 {offsets = [0, 128], sizes = [16, 64], strides = [1, 1]} : vector<16x192xf32> to vector<16x64xf32>
    %100 = vector.extract_strided_slice %90 {offsets = [0, 192], sizes = [16, 64], strides = [1, 1]} : vector<16x256xf32> to vector<16x64xf32>
    %101 = math.tanh %100 : vector<16x64xf32>
    %102 = arith.mulf %98, %82 : vector<16x64xf32>
    %103 = arith.mulf %97, %101 : vector<16x64xf32>
    %104 = arith.addf %102, %103 : vector<16x64xf32>
    %105 = math.tanh %104 : vector<16x64xf32>
    %106 = arith.mulf %99, %105 : vector<16x64xf32>
    %107 = arith.addi %14, %c2_i32 : i32
    %108 = vector.broadcast %107 : i32 to vector<16x1xi32>
    %109 = arith.cmpi slt, %108, %13 : vector<16x1xi32>
    %110 = vector.shape_cast %109 : vector<16x1xi1> to vector<16x1xi1>
    %111 = vector.broadcast %110 : vector<16x1xi1> to vector<16x64xi1>
    %112 = arith.select %111, %106, %79 : vector<16x64xi1>, vector<16x64xf32>
    %113 = vector.shape_cast %109 : vector<16x1xi1> to vector<16x1xi1>
    %114 = vector.broadcast %113 : vector<16x1xi1> to vector<16x64xi1>
    %115 = arith.select %114, %104, %82 : vector<16x64xi1>, vector<16x64xf32>
    %c3_i32 = arith.constant 3 : i32
    %c16_i32_29 = arith.constant 16 : i32
    %116 = arith.muli %c3_i32, %c16_i32_29 : i32
    %117 = tpu.assume_multiple %116, 16 : i32
    %118 = arith.index_cast %117 : i32 to index
    %c0_30 = arith.constant 0 : index
    %119 = vector.load %arg12[%118, %c0_30] : memref<128x256xbf16, #tpu.memory_space<vmem>>, vector<16x256xbf16>
    %120 = arith.extf %119 : vector<16x256xbf16> to vector<16x256xf32>
    %121 = arith.truncf %112 : vector<16x64xf32> to vector<16x64xbf16>
    %cst_31 = arith.constant dense<0.000000e+00> : vector<16x256xf32>
    %122 = tpu.matmul %121, %12, %cst_31 {dimension_numbers = #tpu.dot_dimension_numbers<[1], [0], [0], [1], [0, 0, 1, 1], [], []>} : vector<16x64xbf16>, vector<64x256xbf16>, vector<16x256xf32> -> vector<16x256xf32>
    %123 = arith.addf %120, %122 : vector<16x256xf32>
    %124 = vector.extract_strided_slice %123 {offsets = [0, 0], sizes = [16, 192], strides = [1, 1]} : vector<16x256xf32> to vector<16x192xf32>
    %125 = arith.negf %124 : vector<16x192xf32>
    %126 = math.exp %125 : vector<16x192xf32>
    %cst_32 = arith.constant 1.000000e+00 : f32
    %127 = vector.broadcast %cst_32 : f32 to vector<16x192xf32>
    %128 = arith.addf %127, %126 : vector<16x192xf32>
    %129 = arith.divf %127, %128 : vector<16x192xf32>
    %130 = vector.extract_strided_slice %129 {offsets = [0, 0], sizes = [16, 64], strides = [1, 1]} : vector<16x192xf32> to vector<16x64xf32>
    %131 = vector.extract_strided_slice %129 {offsets = [0, 64], sizes = [16, 64], strides = [1, 1]} : vector<16x192xf32> to vector<16x64xf32>
    %132 = vector.extract_strided_slice %129 {offsets = [0, 128], sizes = [16, 64], strides = [1, 1]} : vector<16x192xf32> to vector<16x64xf32>
    %133 = vector.extract_strided_slice %123 {offsets = [0, 192], sizes = [16, 64], strides = [1, 1]} : vector<16x256xf32> to vector<16x64xf32>
    %134 = math.tanh %133 : vector<16x64xf32>
    %135 = arith.mulf %131, %115 : vector<16x64xf32>
    %136 = arith.mulf %130, %134 : vector<16x64xf32>
    %137 = arith.addf %135, %136 : vector<16x64xf32>
    %138 = math.tanh %137 : vector<16x64xf32>
    %139 = arith.mulf %132, %138 : vector<16x64xf32>
    %140 = arith.addi %14, %c3_i32 : i32
    %141 = vector.broadcast %140 : i32 to vector<16x1xi32>
    %142 = arith.cmpi slt, %141, %13 : vector<16x1xi32>
    %143 = vector.shape_cast %142 : vector<16x1xi1> to vector<16x1xi1>
    %144 = vector.broadcast %143 : vector<16x1xi1> to vector<16x64xi1>
    %145 = arith.select %144, %139, %112 : vector<16x64xi1>, vector<16x64xf32>
    %146 = vector.shape_cast %142 : vector<16x1xi1> to vector<16x1xi1>
    %147 = vector.broadcast %146 : vector<16x1xi1> to vector<16x64xi1>
    %148 = arith.select %147, %137, %115 : vector<16x64xi1>, vector<16x64xf32>
    %c4_i32 = arith.constant 4 : i32
    %c16_i32_33 = arith.constant 16 : i32
    %149 = arith.muli %c4_i32, %c16_i32_33 : i32
    %150 = tpu.assume_multiple %149, 16 : i32
    %151 = arith.index_cast %150 : i32 to index
    %c0_34 = arith.constant 0 : index
    %152 = vector.load %arg12[%151, %c0_34] : memref<128x256xbf16, #tpu.memory_space<vmem>>, vector<16x256xbf16>
    %153 = arith.extf %152 : vector<16x256xbf16> to vector<16x256xf32>
    %154 = arith.truncf %145 : vector<16x64xf32> to vector<16x64xbf16>
    %cst_35 = arith.constant dense<0.000000e+00> : vector<16x256xf32>
    %155 = tpu.matmul %154, %12, %cst_35 {dimension_numbers = #tpu.dot_dimension_numbers<[1], [0], [0], [1], [0, 0, 1, 1], [], []>} : vector<16x64xbf16>, vector<64x256xbf16>, vector<16x256xf32> -> vector<16x256xf32>
    %156 = arith.addf %153, %155 : vector<16x256xf32>
    %157 = vector.extract_strided_slice %156 {offsets = [0, 0], sizes = [16, 192], strides = [1, 1]} : vector<16x256xf32> to vector<16x192xf32>
    %158 = arith.negf %157 : vector<16x192xf32>
    %159 = math.exp %158 : vector<16x192xf32>
    %cst_36 = arith.constant 1.000000e+00 : f32
    %160 = vector.broadcast %cst_36 : f32 to vector<16x192xf32>
    %161 = arith.addf %160, %159 : vector<16x192xf32>
    %162 = arith.divf %160, %161 : vector<16x192xf32>
    %163 = vector.extract_strided_slice %162 {offsets = [0, 0], sizes = [16, 64], strides = [1, 1]} : vector<16x192xf32> to vector<16x64xf32>
    %164 = vector.extract_strided_slice %162 {offsets = [0, 64], sizes = [16, 64], strides = [1, 1]} : vector<16x192xf32> to vector<16x64xf32>
    %165 = vector.extract_strided_slice %162 {offsets = [0, 128], sizes = [16, 64], strides = [1, 1]} : vector<16x192xf32> to vector<16x64xf32>
    %166 = vector.extract_strided_slice %156 {offsets = [0, 192], sizes = [16, 64], strides = [1, 1]} : vector<16x256xf32> to vector<16x64xf32>
    %167 = math.tanh %166 : vector<16x64xf32>
    %168 = arith.mulf %164, %148 : vector<16x64xf32>
    %169 = arith.mulf %163, %167 : vector<16x64xf32>
    %170 = arith.addf %168, %169 : vector<16x64xf32>
    %171 = math.tanh %170 : vector<16x64xf32>
    %172 = arith.mulf %165, %171 : vector<16x64xf32>
    %173 = arith.addi %14, %c4_i32 : i32
    %174 = vector.broadcast %173 : i32 to vector<16x1xi32>
    %175 = arith.cmpi slt, %174, %13 : vector<16x1xi32>
    %176 = vector.shape_cast %175 : vector<16x1xi1> to vector<16x1xi1>
    %177 = vector.broadcast %176 : vector<16x1xi1> to vector<16x64xi1>
    %178 = arith.select %177, %172, %145 : vector<16x64xi1>, vector<16x64xf32>
    %179 = vector.shape_cast %175 : vector<16x1xi1> to vector<16x1xi1>
    %180 = vector.broadcast %179 : vector<16x1xi1> to vector<16x64xi1>
    %181 = arith.select %180, %170, %148 : vector<16x64xi1>, vector<16x64xf32>
    %c5_i32 = arith.constant 5 : i32
    %c16_i32_37 = arith.constant 16 : i32
    %182 = arith.muli %c5_i32, %c16_i32_37 : i32
    %183 = tpu.assume_multiple %182, 16 : i32
    %184 = arith.index_cast %183 : i32 to index
    %c0_38 = arith.constant 0 : index
    %185 = vector.load %arg12[%184, %c0_38] : memref<128x256xbf16, #tpu.memory_space<vmem>>, vector<16x256xbf16>
    %186 = arith.extf %185 : vector<16x256xbf16> to vector<16x256xf32>
    %187 = arith.truncf %178 : vector<16x64xf32> to vector<16x64xbf16>
    %cst_39 = arith.constant dense<0.000000e+00> : vector<16x256xf32>
    %188 = tpu.matmul %187, %12, %cst_39 {dimension_numbers = #tpu.dot_dimension_numbers<[1], [0], [0], [1], [0, 0, 1, 1], [], []>} : vector<16x64xbf16>, vector<64x256xbf16>, vector<16x256xf32> -> vector<16x256xf32>
    %189 = arith.addf %186, %188 : vector<16x256xf32>
    %190 = vector.extract_strided_slice %189 {offsets = [0, 0], sizes = [16, 192], strides = [1, 1]} : vector<16x256xf32> to vector<16x192xf32>
    %191 = arith.negf %190 : vector<16x192xf32>
    %192 = math.exp %191 : vector<16x192xf32>
    %cst_40 = arith.constant 1.000000e+00 : f32
    %193 = vector.broadcast %cst_40 : f32 to vector<16x192xf32>
    %194 = arith.addf %193, %192 : vector<16x192xf32>
    %195 = arith.divf %193, %194 : vector<16x192xf32>
    %196 = vector.extract_strided_slice %195 {offsets = [0, 0], sizes = [16, 64], strides = [1, 1]} : vector<16x192xf32> to vector<16x64xf32>
    %197 = vector.extract_strided_slice %195 {offsets = [0, 64], sizes = [16, 64], strides = [1, 1]} : vector<16x192xf32> to vector<16x64xf32>
    %198 = vector.extract_strided_slice %195 {offsets = [0, 128], sizes = [16, 64], strides = [1, 1]} : vector<16x192xf32> to vector<16x64xf32>
    %199 = vector.extract_strided_slice %189 {offsets = [0, 192], sizes = [16, 64], strides = [1, 1]} : vector<16x256xf32> to vector<16x64xf32>
    %200 = math.tanh %199 : vector<16x64xf32>
    %201 = arith.mulf %197, %181 : vector<16x64xf32>
    %202 = arith.mulf %196, %200 : vector<16x64xf32>
    %203 = arith.addf %201, %202 : vector<16x64xf32>
    %204 = math.tanh %203 : vector<16x64xf32>
    %205 = arith.mulf %198, %204 : vector<16x64xf32>
    %206 = arith.addi %14, %c5_i32 : i32
    %207 = vector.broadcast %206 : i32 to vector<16x1xi32>
    %208 = arith.cmpi slt, %207, %13 : vector<16x1xi32>
    %209 = vector.shape_cast %208 : vector<16x1xi1> to vector<16x1xi1>
    %210 = vector.broadcast %209 : vector<16x1xi1> to vector<16x64xi1>
    %211 = arith.select %210, %205, %178 : vector<16x64xi1>, vector<16x64xf32>
    %212 = vector.shape_cast %208 : vector<16x1xi1> to vector<16x1xi1>
    %213 = vector.broadcast %212 : vector<16x1xi1> to vector<16x64xi1>
    %214 = arith.select %213, %203, %181 : vector<16x64xi1>, vector<16x64xf32>
    %c6_i32 = arith.constant 6 : i32
    %c16_i32_41 = arith.constant 16 : i32
    %215 = arith.muli %c6_i32, %c16_i32_41 : i32
    %216 = tpu.assume_multiple %215, 16 : i32
    %217 = arith.index_cast %216 : i32 to index
    %c0_42 = arith.constant 0 : index
    %218 = vector.load %arg12[%217, %c0_42] : memref<128x256xbf16, #tpu.memory_space<vmem>>, vector<16x256xbf16>
    %219 = arith.extf %218 : vector<16x256xbf16> to vector<16x256xf32>
    %220 = arith.truncf %211 : vector<16x64xf32> to vector<16x64xbf16>
    %cst_43 = arith.constant dense<0.000000e+00> : vector<16x256xf32>
    %221 = tpu.matmul %220, %12, %cst_43 {dimension_numbers = #tpu.dot_dimension_numbers<[1], [0], [0], [1], [0, 0, 1, 1], [], []>} : vector<16x64xbf16>, vector<64x256xbf16>, vector<16x256xf32> -> vector<16x256xf32>
    %222 = arith.addf %219, %221 : vector<16x256xf32>
    %223 = vector.extract_strided_slice %222 {offsets = [0, 0], sizes = [16, 192], strides = [1, 1]} : vector<16x256xf32> to vector<16x192xf32>
    %224 = arith.negf %223 : vector<16x192xf32>
    %225 = math.exp %224 : vector<16x192xf32>
    %cst_44 = arith.constant 1.000000e+00 : f32
    %226 = vector.broadcast %cst_44 : f32 to vector<16x192xf32>
    %227 = arith.addf %226, %225 : vector<16x192xf32>
    %228 = arith.divf %226, %227 : vector<16x192xf32>
    %229 = vector.extract_strided_slice %228 {offsets = [0, 0], sizes = [16, 64], strides = [1, 1]} : vector<16x192xf32> to vector<16x64xf32>
    %230 = vector.extract_strided_slice %228 {offsets = [0, 64], sizes = [16, 64], strides = [1, 1]} : vector<16x192xf32> to vector<16x64xf32>
    %231 = vector.extract_strided_slice %228 {offsets = [0, 128], sizes = [16, 64], strides = [1, 1]} : vector<16x192xf32> to vector<16x64xf32>
    %232 = vector.extract_strided_slice %222 {offsets = [0, 192], sizes = [16, 64], strides = [1, 1]} : vector<16x256xf32> to vector<16x64xf32>
    %233 = math.tanh %232 : vector<16x64xf32>
    %234 = arith.mulf %230, %214 : vector<16x64xf32>
    %235 = arith.mulf %229, %233 : vector<16x64xf32>
    %236 = arith.addf %234, %235 : vector<16x64xf32>
    %237 = math.tanh %236 : vector<16x64xf32>
    %238 = arith.mulf %231, %237 : vector<16x64xf32>
    %239 = arith.addi %14, %c6_i32 : i32
    %240 = vector.broadcast %239 : i32 to vector<16x1xi32>
    %241 = arith.cmpi slt, %240, %13 : vector<16x1xi32>
    %242 = vector.shape_cast %241 : vector<16x1xi1> to vector<16x1xi1>
    %243 = vector.broadcast %242 : vector<16x1xi1> to vector<16x64xi1>
    %244 = arith.select %243, %238, %211 : vector<16x64xi1>, vector<16x64xf32>
    %245 = vector.shape_cast %241 : vector<16x1xi1> to vector<16x1xi1>
    %246 = vector.broadcast %245 : vector<16x1xi1> to vector<16x64xi1>
    %247 = arith.select %246, %236, %214 : vector<16x64xi1>, vector<16x64xf32>
    %c7_i32 = arith.constant 7 : i32
    %c16_i32_45 = arith.constant 16 : i32
    %248 = arith.muli %c7_i32, %c16_i32_45 : i32
    %249 = tpu.assume_multiple %248, 16 : i32
    %250 = arith.index_cast %249 : i32 to index
    %c0_46 = arith.constant 0 : index
    %251 = vector.load %arg12[%250, %c0_46] : memref<128x256xbf16, #tpu.memory_space<vmem>>, vector<16x256xbf16>
    %252 = arith.extf %251 : vector<16x256xbf16> to vector<16x256xf32>
    %253 = arith.truncf %244 : vector<16x64xf32> to vector<16x64xbf16>
    %cst_47 = arith.constant dense<0.000000e+00> : vector<16x256xf32>
    %254 = tpu.matmul %253, %12, %cst_47 {dimension_numbers = #tpu.dot_dimension_numbers<[1], [0], [0], [1], [0, 0, 1, 1], [], []>} : vector<16x64xbf16>, vector<64x256xbf16>, vector<16x256xf32> -> vector<16x256xf32>
    %255 = arith.addf %252, %254 : vector<16x256xf32>
    %256 = vector.extract_strided_slice %255 {offsets = [0, 0], sizes = [16, 192], strides = [1, 1]} : vector<16x256xf32> to vector<16x192xf32>
    %257 = arith.negf %256 : vector<16x192xf32>
    %258 = math.exp %257 : vector<16x192xf32>
    %cst_48 = arith.constant 1.000000e+00 : f32
    %259 = vector.broadcast %cst_48 : f32 to vector<16x192xf32>
    %260 = arith.addf %259, %258 : vector<16x192xf32>
    %261 = arith.divf %259, %260 : vector<16x192xf32>
    %262 = vector.extract_strided_slice %261 {offsets = [0, 0], sizes = [16, 64], strides = [1, 1]} : vector<16x192xf32> to vector<16x64xf32>
    %263 = vector.extract_strided_slice %261 {offsets = [0, 64], sizes = [16, 64], strides = [1, 1]} : vector<16x192xf32> to vector<16x64xf32>
    %264 = vector.extract_strided_slice %261 {offsets = [0, 128], sizes = [16, 64], strides = [1, 1]} : vector<16x192xf32> to vector<16x64xf32>
    %265 = vector.extract_strided_slice %255 {offsets = [0, 192], sizes = [16, 64], strides = [1, 1]} : vector<16x256xf32> to vector<16x64xf32>
    %266 = math.tanh %265 : vector<16x64xf32>
    %267 = arith.mulf %263, %247 : vector<16x64xf32>
    %268 = arith.mulf %262, %266 : vector<16x64xf32>
    %269 = arith.addf %267, %268 : vector<16x64xf32>
    %270 = math.tanh %269 : vector<16x64xf32>
    %271 = arith.mulf %264, %270 : vector<16x64xf32>
    %272 = arith.addi %14, %c7_i32 : i32
    %273 = vector.broadcast %272 : i32 to vector<16x1xi32>
    %274 = arith.cmpi slt, %273, %13 : vector<16x1xi32>
    %275 = vector.shape_cast %274 : vector<16x1xi1> to vector<16x1xi1>
    %276 = vector.broadcast %275 : vector<16x1xi1> to vector<16x64xi1>
    %277 = arith.select %276, %271, %244 : vector<16x64xi1>, vector<16x64xf32>
    %278 = vector.shape_cast %274 : vector<16x1xi1> to vector<16x1xi1>
    %279 = vector.broadcast %278 : vector<16x1xi1> to vector<16x64xi1>
    %280 = arith.select %279, %269, %247 : vector<16x64xi1>, vector<16x64xf32>
    %c8_i32_49 = arith.constant 8 : i32
    %c0_50 = arith.constant 0 : index
    %c0_51 = arith.constant 0 : index
    %281 = vector.load %arg13[%c0_50, %c0_51] : memref<16x64xf32, #tpu.memory_space<vmem>>, vector<16x64xf32>
    tpu.vector_store %arg13[%c0_50, %c0_51], %277 {strides = array<i32>} : memref<16x64xf32, #tpu.memory_space<vmem>>, vector<16x64xf32>,
    %c0_52 = arith.constant 0 : index
    %c0_53 = arith.constant 0 : index
    %282 = vector.load %arg14[%c0_52, %c0_53] : memref<16x64xf32, #tpu.memory_space<vmem>>, vector<16x64xf32>
    tpu.vector_store %arg14[%c0_52, %c0_53], %280 {strides = array<i32>} : memref<16x64xf32, #tpu.memory_space<vmem>>, vector<16x64xf32>,
    %c0_i32_54 = arith.constant 0 : i32
    %283 = arith.cmpi eq, %arg1, %c0_i32_54 : i32
    %284 = arith.extui %283 : i1 to i32
    %c0_i32_55 = arith.constant 0 : i32
    %285 = arith.cmpi ne, %284, %c0_i32_55 : i32
    scf.if %285 {
      %286 = arith.truncf %277 : vector<16x64xf32> to vector<16x64xbf16>
      %c0_56 = arith.constant 0 : index
      %c0_57 = arith.constant 0 : index
      %287 = vector.load %arg7[%c0_56, %c0_57] : memref<64x64xbf16, #tpu.memory_space<vmem>>, vector<64x64xbf16>
      %cst_58 = arith.constant dense<0.000000e+00> : vector<16x64xf32>
      %288 = tpu.matmul %286, %287, %cst_58 {dimension_numbers = #tpu.dot_dimension_numbers<[1], [0], [0], [1], [0, 0, 1, 1], [], []>} : vector<16x64xbf16>, vector<64x64xbf16>, vector<16x64xf32> -> vector<16x64xf32>
      %c0_59 = arith.constant 0 : index
      %c0_60 = arith.constant 0 : index
      %289 = vector.load %arg8[%c0_59, %c0_60] : memref<1x64xf32, #tpu.memory_space<vmem>>, vector<1x64xf32>
      %290 = vector.broadcast %289 : vector<1x64xf32> to vector<16x64xf32>
      %291 = arith.addf %288, %290 : vector<16x64xf32>
      %cst_61 = arith.constant 0.000000e+00 : f32
      %292 = vector.broadcast %cst_61 : f32 to vector<16x64xf32>
      %293 = arith.maximumf %291, %292 : vector<16x64xf32>
      %294 = arith.truncf %293 : vector<16x64xf32> to vector<16x64xbf16>
      %c0_62 = arith.constant 0 : index
      %c0_63 = arith.constant 0 : index
      %295 = vector.load %arg9[%c0_62, %c0_63] : memref<64x128xbf16, #tpu.memory_space<vmem>>, vector<64x128xbf16>
      %cst_64 = arith.constant dense<0.000000e+00> : vector<16x128xf32>
      %296 = tpu.matmul %294, %295, %cst_64 {dimension_numbers = #tpu.dot_dimension_numbers<[1], [0], [0], [1], [0, 0, 1, 1], [], []>} : vector<16x64xbf16>, vector<64x128xbf16>, vector<16x128xf32> -> vector<16x128xf32>
      %c0_65 = arith.constant 0 : index
      %c0_66 = arith.constant 0 : index
      %297 = vector.load %arg10[%c0_65, %c0_66] : memref<1x128xf32, #tpu.memory_space<vmem>>, vector<1x128xf32>
      %298 = vector.broadcast %297 : vector<1x128xf32> to vector<16x128xf32>
      %299 = arith.addf %296, %298 : vector<16x128xf32>
      %300 = arith.negf %299 : vector<16x128xf32>
      %301 = math.exp %300 : vector<16x128xf32>
      %cst_67 = arith.constant 1.000000e+00 : f32
      %302 = vector.broadcast %cst_67 : f32 to vector<16x128xf32>
      %303 = arith.addf %302, %301 : vector<16x128xf32>
      %304 = arith.divf %302, %303 : vector<16x128xf32>
      %c0_68 = arith.constant 0 : index
      %c0_69 = arith.constant 0 : index
      %305 = vector.load %arg11[%c0_68, %c0_69] : memref<16x128xf32, #tpu.memory_space<vmem>>, vector<16x128xf32>
      tpu.vector_store %arg11[%c0_68, %c0_69], %304 {strides = array<i32>} : memref<16x128xf32, #tpu.memory_space<vmem>>, vector<16x128xf32>,
    } else {
    }
    return
  }
  func.func @transform_0(%arg0: i32, %arg1: i32) -> (i32, i32, i32) {
    %c0_i32 = arith.constant 0 : i32
    %c0_i32_0 = arith.constant 0 : i32
    return %arg0, %arg1, %c0_i32 : i32, i32, i32
  }
  func.func @transform_1(%arg0: i32, %arg1: i32) -> (i32, i32) {
    %c0_i32 = arith.constant 0 : i32
    %c0_i32_0 = arith.constant 0 : i32
    return %arg0, %c0_i32 : i32, i32
  }
  func.func @transform_2(%arg0: i32, %arg1: i32) -> (i32, i32) {
    %c0_i32 = arith.constant 0 : i32
    %c0_i32_0 = arith.constant 0 : i32
    %c0_i32_1 = arith.constant 0 : i32
    return %c0_i32, %c0_i32_0 : i32, i32
  }
  func.func @transform_3(%arg0: i32, %arg1: i32) -> (i32, i32) {
    %c0_i32 = arith.constant 0 : i32
    %c0_i32_0 = arith.constant 0 : i32
    %c0_i32_1 = arith.constant 0 : i32
    return %c0_i32, %c0_i32_0 : i32, i32
  }
  func.func @transform_4(%arg0: i32, %arg1: i32) -> (i32, i32) {
    %c0_i32 = arith.constant 0 : i32
    %c0_i32_0 = arith.constant 0 : i32
    %c0_i32_1 = arith.constant 0 : i32
    return %c0_i32, %c0_i32_0 : i32, i32
  }
  func.func @transform_5(%arg0: i32, %arg1: i32) -> (i32, i32) {
    %c0_i32 = arith.constant 0 : i32
    %c0_i32_0 = arith.constant 0 : i32
    %c0_i32_1 = arith.constant 0 : i32
    return %c0_i32, %c0_i32_0 : i32, i32
  }
  func.func @transform_6(%arg0: i32, %arg1: i32) -> (i32, i32) {
    %c0_i32 = arith.constant 0 : i32
    %c0_i32_0 = arith.constant 0 : i32
    %c0_i32_1 = arith.constant 0 : i32
    return %c0_i32, %c0_i32_0 : i32, i32
  }
  func.func @transform_7(%arg0: i32, %arg1: i32) -> (i32, i32) {
    %c0_i32 = arith.constant 0 : i32
    %c0_i32_0 = arith.constant 0 : i32
    %c0_i32_1 = arith.constant 0 : i32
    return %c0_i32, %c0_i32_0 : i32, i32
  }
  func.func @transform_8(%arg0: i32, %arg1: i32) -> (i32, i32) {
    %c0_i32 = arith.constant 0 : i32
    %c0_i32_0 = arith.constant 0 : i32
    %c0_i32_1 = arith.constant 0 : i32
    return %c0_i32, %c0_i32_0 : i32, i32
  }
  func.func @transform_9(%arg0: i32, %arg1: i32) -> (i32, i32) {
    %c0_i32 = arith.constant 0 : i32
    %c0_i32_0 = arith.constant 0 : i32
    return %arg0, %c0_i32 : i32, i32
  }
}

</mosaic_0001>

<bundles_post_ra>
// kernel: tpu_custom_call.1
= control target key start
LH: loop header
LB: loop body
LE: loop exit
PB: predicated region body
PF: predicated region fallthrough
CT: control target
= control target key end

     0   :  { %14 = vsyncpa [#allocation6], 0  ;;  %s2978_s0 = inlined_call_operand.vmem [shape: bf16[1,128,20], index: 0, kind: input, shape index: {}]   ;;  %s2979_s1 = inlined_call_operand.vmem [shape: s32[16,1], index: 1, kind: input, shape index: {}]   ;;  %s2980_s2 = inlined_call_operand.hbm [shape: bf16[20,256], index: 2, kind: input, shape index: {}]   ;;  %s2981_s3 = inlined_call_operand.vmem [shape: bf16[64,256], index: 3, kind: input, shape index: {}]   ;;  %s2982_s4 = inlined_call_operand.vmem [shape: f32[1,256], index: 4, kind: input, shape index: {}]   ;;  %s2983_s5 = inlined_call_operand.vmem [shape: bf16[64,64], index: 5, kind: input, shape index: {}]   ;;  %s2984_s6 = inlined_call_operand.vmem [shape: f32[1,64], index: 6, kind: input, shape index: {}]   ;;  %s2985_s7 = inlined_call_operand.hbm [shape: bf16[64,128], index: 7, kind: input, shape index: {}]   ;;  %s2986_s8 = inlined_call_operand.vmem [shape: f32[1,128], index: 8, kind: input, shape index: {}]   ;;  %s2987_s9 = inlined_call_operand.hbm [shape: f32[16,128], index: 9, kind: output, shape index: {}]  }
   0x1   :  { %15 = vsyncpa [#allocation9], 0 }
   0x2   :  { %16 = vsyncpa [#allocation7], 0  ;;  %s2184_s30 = smov [#allocation5]   ;;  %s2112_s13 = scalar_lea.hbm %s2980_s2, 384 }
   0x3   :  { %s26_s10 = sshll.u32 %s2184_s30, 4  ;;  %p2113_p0 = scmp.ne.s32.totalorder %s2980_s2, %s2112_s13  ;;  %s27_s10 = int_to_ptr.vmem [resolvable:$true] %s26_s10 }
   0x4   :  { %p2116_p1 = scmp.lt.u32.totalorder %s2112_s13, %s2980_s2 }
   0x6   :  { %p2118_p2 = pnand %p2116_p1, %p2113_p0 }
   0x8   :  { %2121 = shalt.err (!%p2118_p2)
}
   0x9   :  { %s2122_s18 = scalar_lea.vmem %s27_s10, 384  ;;  %p2127_p4 = scmp.lt.s32.totalorder %s27_s10, %s27_s10 }
   0xa   :  { %p2123_p3 = scmp.ne.s32.totalorder %s27_s10, %s2122_s18  ;;  %p2128_p5 = scmp.lt.s32.totalorder %s2122_s18, %s2122_s18 }
   0xc   :  { %p2129_p6 = por %p2128_p5, %p2127_p4 }
   0xe   :  { %p2130_p7 = pnand %p2129_p6, %p2123_p3 }
  0x10   :  { %2133 = shalt.err (!%p2130_p7)
}
  0x11   :  { %s2185_s19 = smov 128   ;;  %s2186_s20 = smov 8  }
  0x12   :  { %32 = dma.hbm_to_vmem [thread:$0]  %s2980_s2, 384, %s27_s10, [#allocation6], %s2185_s19, %s2185_s19, %s2186_s20  }
  0x13   :  { %s2187_s23 = smov [#allocation8]   ;;  %s2134_s27 = scalar_lea.hbm %s2985_s7, 512 }
  0x14   :  { %s46_s24 = sshll.u32 %s2187_s23, 4  ;;  %p2135_p8 = scmp.ne.s32.totalorder %s2985_s7, %s2134_s27  ;;  %s47_s24 = int_to_ptr.vmem [resolvable:$true] %s46_s24 }
  0x15   :  { %p2138_p9 = scmp.lt.u32.totalorder %s2134_s27, %s2985_s7 }
  0x17   :  { %p2140_p10 = pnand %p2138_p9, %p2135_p8 }
  0x19   :  { %2143 = shalt.err (!%p2140_p10)
}
  0x1a   :  { %s2144_s12 = scalar_lea.vmem %s47_s24, 512  ;;  %p2149_p12 = scmp.lt.s32.totalorder %s47_s24, %s47_s24 }
  0x1b   :  { %p2145_p11 = scmp.ne.s32.totalorder %s47_s24, %s2144_s12  ;;  %p2150_p13 = scmp.lt.s32.totalorder %s2144_s12, %s2144_s12 }
  0x1d   :  { %p2151_p0 = por %p2150_p13, %p2149_p12 }
  0x1f   :  { %p2152_p1 = pnand %p2151_p0, %p2145_p11 }
  0x21   :  { %2155 = shalt.err (!%p2152_p1)
}
  0x22   :  { %s2188_s2 = smov 64   ;;  %s2189_s10 = smov 4  }
  0x23   :  { %52 = dma.hbm_to_vmem [thread:$0]  %s2985_s7, 512, %s47_s24, [#allocation9], %s2188_s2, %s2188_s2, %s2189_s10  }
  0x24   :  { %2178 = dma.done.wait [#allocation6], 384  }
  0x25   :  { %2179 = vsyncadd [#allocation6], 4294966912 }
  0x26   :  { %2180 = dma.done.wait [#allocation9], 512  }
  0x27   :  { %2181 = vsyncadd [#allocation9], 4294966784  ;;  %vm66_vm0 = vcmask 523264   ;;  %v2190_v0 = vmov 0   ;;  %v2191_v1 = vmov 0.0   ;;  %vm182_vm1 = vcmask 1041408  }
  0x28   :  { %221 = vmatprep.mubr.bf16.mxu0 %v2190_v0  ;;  %435 = vmatprep.mubr.bf16.mxu1 %v2190_v0  ;;  %67 = vst.msk [vmem:[#allocation3] sm:$0xff] %vm66_vm0, %v2191_v1  ;;  %68 = vst.msk [vmem:[#allocation3 + $0x8] sm:$0xff] %vm66_vm0, %v2191_v1  ;;  %v1870_v2 = vld [vmem:[#allocation5 + $0x4] ss:$8 sps:$4 sm:$0xff]   ;;  %v1874_v4 = vld [vmem:[#allocation5] ss:$8 sps:$4 sm:$0xff]   ;;  %v92_v22 = vlaneseq }
  0x29   :  { %69 = vst.msk [vmem:[#allocation4] sm:$0xff] %vm66_vm0, %v2191_v1  ;;  %70 = vst.msk [vmem:[#allocation4 + $0x8] sm:$0xff] %vm66_vm0, %v2191_v1  ;;  %1868 = vset.pattern.permute.xlu0 %v2190_v0  ;;  %1869 = vset.pattern.permute.xlu1 %v2190_v0  ;;  %v2288_v3 = vld [vmem:[%s2981_s3 + $0x4] ss:$8 sps:$4 sm:$0xff]   ;;  %v2293_v5 = vld [vmem:[%s2981_s3] ss:$8 sps:$4 sm:$0xff]  }
  0x2a   :  { %189 = vmatprep.subr.bf16.mxu0 %v1870_v2  ;;  %v89_v6 = vld [vmem:[#allocation5 + $0x10] sm:$0x33]  ;;  %403 = vmatprep.subr.bf16.mxu1 %v2288_v3  ;;  %v2311_v12 = vld [vmem:[%s2981_s3 + $0x24] ss:$8 sps:$4 sm:$0xff]   ;;  %vm157_vm2 = vcmask 162816   ;;  %v93_v23 = vshrl.u32 %v92_v22, 7 }
  0x2b   :  { %v1736_v7 = vcombine.high %v89_v6, %v89_v6  ;;  %v2299_v8 = vld [vmem:[%s2981_s3 + $0x14] ss:$8 sps:$4 sm:$0xff]   ;;  %v1735_v9 = vcombine.low %v89_v6, %v89_v6  ;;  %190 = vmatpush1.bf16.msra.mxu0 %v1874_v4  ;;  %404 = vmatpush1.bf16.msra.mxu1 %v2293_v5  ;;  %v2305_v10 = vld [vmem:[%s2981_s3 + $0x10] ss:$8 sps:$4 sm:$0xff]   ;;  %v1881_v13 = vld [vmem:[%s2978_s0] sm:$0xff]  }
  0x2c   :  { %405 = vmatprep.subr.bf16.mxu1 %v2299_v8  ;;  %v2320_v14 = vld [vmem:[%s2981_s3 + $0x20] ss:$8 sps:$4 sm:$0xff]   ;;  %v2326_v16 = vld [vmem:[%s2981_s3 + $0x34] ss:$8 sps:$4 sm:$0xff]   ;;  %v2332_v18 = vld [vmem:[%s2981_s3 + $0x30] ss:$8 sps:$4 sm:$0xff]  }
  0x2d   :  { %1737 = vmatprep.subr.msk.bf16.mxu0 %vm182_vm1, %v1736_v7  ;;  %v184_v11 = vsel %vm182_vm1, %v1735_v9, 0  ;;  %v94_v24 = vsub.s32 0, %v93_v23  ;;  %v90_v25 = vld [vmem:[%s2982_s4] sm:$0x3]  ;;  %v98_v26 = vsub.s32 1, %v93_v23  ;;  %v2389_v63 = vld [vmem:[%s2979_s1 + $0x8] sm:$0xff] }
  0x2e   :  { %v2382_v59 = vld [vmem:[%s2979_s1] sm:$0xff]  ;;  %vm1760_vm4 = vcmp.gt.s32.totalorder %v2389_v63, 0  ;;  %v1888_v22 = vld [vmem:[%s2978_s0 + $0x8] sm:$0xff]   ;;  %vm1767_vm8 = vcmp.gt.s32.totalorder %v2389_v63, 1  ;;  %vm1774_vm12 = vcmp.gt.s32.totalorder %v2389_v63, 2  ;;  %vm1781_vm1 = vcmp.gt.s32.totalorder %v2389_v63, 3 }
  0x2f   :  { %192 = vmatpush1.bf16.msra.mxu0 %v184_v11  ;;  %406 = vmatpush1.bf16.msra.mxu1 %v2305_v10  ;;  %v2334_v19 = vld [vmem:[#allocation3] sm:$0xff]  ;;  %v2336_v20 = vld [vmem:[#allocation3 + $0x8] sm:$0xff]  ;;  %v2369_v27 = vrot.slane %v90_v25, %v94_v24  ;;  %v2371_v29 = vrot.slane %v90_v25, %v98_v26  ;;  %vm1759_vm3 = vcmp.gt.s32.totalorder %v2382_v59, 0  ;;  %v522_v9 = vsel %vm1760_vm4, 1, %v2190_v0 }
  0x30   :  { %v347_v15 = vld [vmem:[#allocation4] sm:$0xff]  ;;  %407 = vmatprep.subr.bf16.mxu1 %v2311_v12  ;;  %v348_v17 = vld [vmem:[#allocation4 + $0x8] sm:$0xff]  ;;  %962 = vmatprep.subr.bf16.mxu0 %v2288_v3  ;;  %v358_v21 = vpack.c.bf16 %v2336_v20, %v2334_v19  ;;  %v521_v2 = vsel %vm1759_vm3, 1, %v2190_v0  ;;  %vm1766_vm7 = vcmp.gt.s32.totalorder %v2382_v59, 1  ;;  %vm1773_vm11 = vcmp.gt.s32.totalorder %v2382_v59, 2 }
  0x31   :  { %478 = vrot.lane.b32.xlu1 %v347_v15, %s2188_s2  ;;  %vm1780_vm15 = vcmp.gt.s32.totalorder %v2382_v59, 3  ;;  %vm1787_vm4 = vcmp.gt.s32.totalorder %v2382_v59, 4 }
  0x32   :  { %1738 = vmatmul.mubr.msk.bf16.vlgmr.msra.gmra.mrb[0].mxu0 %vm157_vm2, %v1881_v13 }
  0x33   :  { %408 = vmatpush1.bf16.msra.mxu1 %v2320_v14  ;;  %231 = vmatprep.mubr.bf16.mxu0 %v2190_v0 }
  0x34   :  { %409 = vmatprep.subr.bf16.mxu1 %v2326_v16  ;;  %963 = vmatpush1.bf16.msra.mxu0 %v2293_v5 }
  0x35   :  { %480 = vrot.lane.b32.xlu1 %v348_v17, %s2188_s2  ;;  %964 = vmatprep.subr.bf16.mxu0 %v2299_v8 }
  0x37   :  { %410 = vmatpush1.bf16.msra.mxu1 %v2332_v18 }
  0x38   :  { %548 = vmatprep.subr.bf16.mxu1 %v2288_v3  ;;  %965 = vmatpush1.bf16.msra.mxu0 %v2305_v10 }
  0x39   :  { %966 = vmatprep.subr.bf16.mxu0 %v2311_v12 }
  0x3a   :  { %1754 = vmatmul.mubr.msk.bf16.vlgmr.msra.gmra.mrb[0].mxu1 %vm66_vm0, %v358_v21  ;;  %1739 = vmatmul.mubr.msk.bf16.gmra.mrb[4].mxu0 %vm157_vm2, %v1888_v22 }
  0x3b   :  { %549 = vmatpush1.bf16.msra.mxu1 %v2293_v5  ;;  %580 = vmatprep.mubr.bf16.mxu1 %v2190_v0 }
  0x3c   :  { %550 = vmatprep.subr.bf16.mxu1 %v2299_v8  ;;  %967 = vmatpush1.bf16.msra.mxu0 %v2320_v14 }
  0x3d   :  { %968 = vmatprep.subr.bf16.mxu0 %v2326_v16  ;;  %241 = vmatprep.mubr.bf16.mxu0 %v2190_v0 }
  0x3f   :  { %551 = vmatpush1.bf16.msra.mxu1 %v2305_v10 }
  0x40   :  { %552 = vmatprep.subr.bf16.mxu1 %v2311_v12  ;;  %969 = vmatpush1.bf16.msra.mxu0 %v2332_v18 }
  0x41   :  { %1238 = vmatprep.subr.bf16.mxu0 %v2288_v3 }
  0x43   :  { %553 = vmatpush1.bf16.msra.mxu1 %v2320_v14 }
  0x44   :  { %554 = vmatprep.subr.bf16.mxu1 %v2326_v16 }
  0x47   :  { %555 = vmatpush1.bf16.msra.mxu1 %v2332_v18 }
  0x48   :  { %686 = vmatprep.subr.bf16.mxu1 %v2288_v3 }
  0xa3   :  { %v2395_v11 = vpop.permute.xlu1 %478 }
  0xa7   :  { %v2398_v17 = vpop.permute.xlu1 %480 }
 0x105   :  { %v223_v28 = vpop.f32.mrb[0].mxu0 }
 0x106   :  { %v225_v30 = vpop.f32.mrb[1].mxu0  ;;  %v224_v32 = vadd.f32 %v223_v28, %v2369_v27 }
 0x107   :  { %v227_v31 = vpop.f32.mrb[2].mxu0  ;;  %v226_v35 = vadd.f32 %v225_v30, %v2371_v29 }
 0x108   :  { %v228_v33 = vadd.f32 %v227_v31, %v2369_v27  ;;  %v229_v34 = vpop.f32.mrb[3].mxu0 }
 0x109   :  { %v230_v36 = vadd.f32 %v229_v34, %v2371_v29 }
 0x10a   :  { %v302_v37 = vpack.c.bf16 %v228_v33, %v224_v32 }
 0x10b   :  { %v303_v38 = vpack.c.bf16 %v230_v36, %v226_v35 }
 0x10c   :  { %v354_v39 = vunpack.c.l.bf16 %v302_v37  ;;  %v356_v44 = vunpack.c.h.bf16 %v302_v37 }
 0x10d   :  { %v437_v40 = vpop.f32.mrb[0].mxu1  ;;  %v355_v41 = vunpack.c.l.bf16 %v303_v38  ;;  %v357_v47 = vunpack.c.h.bf16 %v303_v38 }
 0x10e   :  { %v446_v42 = vadd.f32 %v437_v40, %v354_v39  ;;  %v439_v43 = vpop.f32.mrb[1].mxu1 }
 0x10f   :  { %v447_v45 = vadd.f32 %v439_v43, %v355_v41  ;;  %v441_v46 = vpop.f32.mrb[2].mxu1 }
 0x110   :  { %v448_v48 = vadd.f32 %v441_v46, %v356_v44  ;;  %v443_v49 = vpop.f32.mrb[3].mxu1  ;;  %v1755_v53 = vmul.f32 -1.442695, %v446_v42 }
 0x111   :  { %v449_v50 = vadd.f32 %v443_v49, %v357_v47  ;;  %1903 = vtanh.f32 %v447_v45  ;;  %v1756_v30 = vmul.f32 -1.442695, %v447_v45 }
 0x112   :  { %v1757_v54 = vmul.f32 -1.442695, %v448_v48 }
 0x113   :  { %1905 = vtanh.f32 %v449_v50  ;;  %v1758_v31 = vmul.f32 -1.442695, %v449_v50 }
 0x114   :  { %1907 = vpow2.f32 %v1755_v53 }
 0x115   :  { %1909 = vpow2.f32 %v1757_v54 }
 0x11b   :  { %v1904_v51 = vpop.eup %1903 }
 0x11c   :  { %488 = vrot.lane.b32.xlu0 %v1904_v51, %s2188_s2 }
 0x11d   :  { %v1906_v52 = vpop.eup %1905 }
 0x11e   :  { %v1908_v55 = vpop.eup %1907 }
 0x11f   :  { %v462_v56 = vadd.f32 1.0, %v1908_v55  ;;  %v1910_v57 = vpop.eup %1909 }
 0x120   :  { %490 = vrot.lane.b32.xlu0 %v1906_v52, %s2188_s2  ;;  %v464_v58 = vadd.f32 1.0, %v1910_v57 }
 0x121   :  { %1911 = vrcp.f32 %v462_v56 }
 0x122   :  { %1913 = vrcp.f32 %v464_v58 }
 0x12b   :  { %v1912_v60 = vpop.eup %1911 }
 0x12c   :  { %v1914_v4 = vpop.eup %1913  ;;  %v484_v13 = vmul.f32 %v1912_v60, %v2395_v11 }
 0x12d   :  { %v485_v23 = vmul.f32 %v1914_v4, %v2398_v17 }
 0x18e   :  { %v489_v61 = vpop.permute.xlu0 %488 }
 0x18f   :  { %v494_v62 = vmul.f32 %v1912_v60, %v489_v61 }
 0x191   :  { %498 = vrot.lane.b32.xlu0 %v494_v62, %s2188_s2 }
 0x192   :  { %v491_v6 = vpop.permute.xlu0 %490 }
 0x193   :  { %v495_v7 = vmul.f32 %v1914_v4, %v491_v6 }
 0x195   :  { %524 = vperm.xlu0 %1868, %v521_v2   ;;  %500 = vrot.lane.b32.xlu1 %v495_v7, %s2188_s2 }
 0x199   :  { %527 = vperm.xlu1 %1869, %v522_v9  }
 0x203   :  { %v499_v15 = vpop.permute.xlu0 %498 }
 0x204   :  { %v2400_v21 = vadd.f32 %v499_v15, %v484_v13 }
 0x206   :  { %1915 = vtanh.f32 %v2400_v21 }
 0x207   :  { %v501_v24 = vpop.permute.xlu1 %500 }
 0x208   :  { %v2409_v25 = vadd.f32 %v501_v24, %v485_v23 }
 0x20a   :  { %1917 = vtanh.f32 %v2409_v25 }
 0x20b   :  { %1919 = vpow2.f32 %v1756_v30 }
 0x20c   :  { %1921 = vpow2.f32 %v1758_v31 }
 0x210   :  { %v1916_v26 = vpop.eup %1915 }
 0x211   :  { %510 = vrot.lane.b32.xlu1 %v1916_v26, %s2188_s2 }
 0x214   :  { %v1918_v28 = vpop.eup %1917  ;;  %v2416_v37 = vpop.permute.xlu0 %524 }
 0x215   :  { %512 = vrot.lane.b32.xlu0 %v1918_v28, %s2188_s2  ;;  %v1920_v32 = vpop.eup %1919  ;;  %vm529_vm5 = vcmp.eq.s32.totalorder %v2416_v37, 1 }
 0x216   :  { %v1922_v33 = vpop.eup %1921  ;;  %v463_v34 = vadd.f32 1.0, %v1920_v32 }
 0x217   :  { %v465_v35 = vadd.f32 1.0, %v1922_v33 }
 0x218   :  { %1923 = vrcp.f32 %v463_v34  ;;  %v2414_v36 = vpop.permute.xlu1 %527  ;;  %v659_v34 = vsel %vm1766_vm7, 1, %v2190_v0 }
 0x219   :  { %1925 = vrcp.f32 %v465_v35  ;;  %vm530_vm6 = vcmp.eq.s32.totalorder %v2414_v36, 1 }
 0x222   :  { %v1924_v39 = vpop.eup %1923 }
 0x223   :  { %v1926_v41 = vpop.eup %1925 }
 0x283   :  { %v511_v38 = vpop.permute.xlu1 %510 }
 0x284   :  { %v516_v40 = vmul.f32 %v1924_v39, %v511_v38 }
 0x286   :  { %v2423_v44 = vsel %vm529_vm5, %v516_v40, %v2334_v19  ;;  %v233_v19 = vpop.f32.mrb[4].mxu0  ;;  %v660_v40 = vsel %vm1767_vm8, 1, %v2190_v0 }
 0x287   :  { %v513_v42 = vpop.permute.xlu0 %512  ;;  %v235_v47 = vpop.f32.mrb[5].mxu0 }
 0x288   :  { %v517_v43 = vmul.f32 %v1926_v41, %v513_v42  ;;  %v236_v48 = vadd.f32 %v235_v47, %v2371_v29  ;;  %v237_v49 = vpop.f32.mrb[6].mxu0  ;;  %v1889_v41 = vld [vmem:[%s2978_s0 + $0x10] sm:$0xff]   ;;  %v2463_v42 = vsel %vm529_vm5, %v2400_v21, %v2395_v11  ;;  %vm1788_vm5 = vcmp.gt.s32.totalorder %v2389_v63, 4 }
 0x289   :  { %v238_v50 = vadd.f32 %v237_v49, %v2369_v27  ;;  %v239_v51 = vpop.f32.mrb[7].mxu0  ;;  %1740 = vmatmul.mubr.msk.bf16.gmra.mrb[8].mxu0 %vm157_vm2, %v1889_v41 }
 0x28a   :  { %v2428_v45 = vsel %vm530_vm6, %v517_v43, %v2336_v20  ;;  %v234_v20 = vadd.f32 %v233_v19, %v2369_v27  ;;  %v240_v52 = vadd.f32 %v239_v51, %v2371_v29  ;;  %251 = vmatprep.mubr.bf16.mxu0 %v2190_v0 }
 0x28b   :  { %v544_v46 = vpack.c.bf16 %v2428_v45, %v2423_v44 }
 0x28c   :  { %v304_v53 = vpack.c.bf16 %v238_v50, %v234_v20  ;;  %v305_v54 = vpack.c.bf16 %v240_v52, %v236_v48  ;;  %v2472_v20 = vsel %vm530_vm6, %v2409_v25, %v2398_v17 }
 0x28d   :  { %1761 = vmatmul.mubr.msk.bf16.vlgmr.msra.gmra.mrb[4].mxu1 %vm66_vm0, %v544_v46 }
 0x28e   :  { %687 = vmatpush1.bf16.msra.mxu1 %v2293_v5  ;;  %718 = vmatprep.mubr.bf16.mxu1 %v2190_v0  ;;  %v540_v55 = vunpack.c.l.bf16 %v304_v53  ;;  %v541_v56 = vunpack.c.l.bf16 %v305_v54  ;;  %v542_v61 = vunpack.c.h.bf16 %v304_v53  ;;  %v543_v4 = vunpack.c.h.bf16 %v305_v54 }
 0x28f   :  { %688 = vmatprep.subr.bf16.mxu1 %v2299_v8 }
 0x292   :  { %689 = vmatpush1.bf16.msra.mxu1 %v2305_v10 }
 0x293   :  { %690 = vmatprep.subr.bf16.mxu1 %v2311_v12 }
 0x296   :  { %691 = vmatpush1.bf16.msra.mxu1 %v2320_v14 }
 0x297   :  { %692 = vmatprep.subr.bf16.mxu1 %v2326_v16 }
 0x29a   :  { %693 = vmatpush1.bf16.msra.mxu1 %v2332_v18 }
 0x29b   :  { %824 = vmatprep.subr.bf16.mxu1 %v2288_v3 }
 0x35c   :  { %v243_v17 = vpop.f32.mrb[8].mxu0 }
 0x35d   :  { %v244_v25 = vadd.f32 %v243_v17, %v2369_v27  ;;  %v245_v36 = vpop.f32.mrb[9].mxu0 }
 0x35e   :  { %v246_v51 = vadd.f32 %v245_v36, %v2371_v29  ;;  %v247_v52 = vpop.f32.mrb[10].mxu0  ;;  %v797_v36 = vsel %vm1773_vm11, 1, %v2190_v0 }
 0x35f   :  { %v248_v53 = vadd.f32 %v247_v52, %v2369_v27  ;;  %v249_v54 = vpop.f32.mrb[11].mxu0 }
 0x360   :  { %v582_v57 = vpop.f32.mrb[4].mxu1 }
 0x361   :  { %v591_v58 = vadd.f32 %v582_v57, %v540_v55  ;;  %v584_v60 = vpop.f32.mrb[5].mxu1  ;;  %v250_v55 = vadd.f32 %v249_v54, %v2371_v29  ;;  %v306_v57 = vpack.c.bf16 %v248_v53, %v244_v25  ;;  %v798_v54 = vsel %vm1774_vm12, 1, %v2190_v0 }
 0x362   :  { %v592_v62 = vadd.f32 %v584_v60, %v541_v56  ;;  %v586_v2 = vpop.f32.mrb[6].mxu1 }
 0x363   :  { %v593_v6 = vadd.f32 %v586_v2, %v542_v61  ;;  %v588_v7 = vpop.f32.mrb[7].mxu1  ;;  %v1762_v22 = vmul.f32 -1.442695, %v591_v58  ;;  %v307_v58 = vpack.c.bf16 %v250_v55, %v246_v51  ;;  %v1890_v55 = vld [vmem:[%s2978_s0 + $0x18] sm:$0xff]  }
 0x364   :  { %1927 = vtanh.f32 %v592_v62  ;;  %v594_v9 = vadd.f32 %v588_v7, %v543_v4  ;;  %v1763_v37 = vmul.f32 -1.442695, %v592_v62  ;;  %1741 = vmatmul.mubr.msk.bf16.gmra.mrb[12].mxu0 %vm157_vm2, %v1890_v55 }
 0x365   :  { %v1764_v23 = vmul.f32 -1.442695, %v593_v6  ;;  %261 = vmatprep.mubr.bf16.mxu0 %v2190_v0 }
 0x366   :  { %1929 = vtanh.f32 %v594_v9  ;;  %v1765_v50 = vmul.f32 -1.442695, %v594_v9 }
 0x367   :  { %1931 = vpow2.f32 %v1762_v22 }
 0x368   :  { %1933 = vpow2.f32 %v1764_v23 }
 0x36e   :  { %v1928_v13 = vpop.eup %1927 }
 0x36f   :  { %625 = vrot.lane.b32.xlu1 %v1928_v13, %s2188_s2 }
 0x370   :  { %v1930_v15 = vpop.eup %1929 }
 0x371   :  { %627 = vrot.lane.b32.xlu0 %v1930_v15, %s2188_s2  ;;  %v1932_v24 = vpop.eup %1931 }
 0x372   :  { %v607_v26 = vadd.f32 1.0, %v1932_v24  ;;  %v1934_v28 = vpop.eup %1933 }
 0x373   :  { %v609_v30 = vadd.f32 1.0, %v1934_v28 }
 0x374   :  { %1935 = vrcp.f32 %v607_v26 }
 0x375   :  { %1937 = vrcp.f32 %v609_v30 }
 0x37e   :  { %v1936_v31 = vpop.eup %1935 }
 0x37f   :  { %v1938_v35 = vpop.eup %1937  ;;  %v621_v43 = vmul.f32 %v1936_v31, %v2463_v42 }
 0x380   :  { %v622_v47 = vmul.f32 %v1938_v35, %v2472_v20 }
 0x3e1   :  { %v626_v32 = vpop.permute.xlu1 %625 }
 0x3e2   :  { %v631_v33 = vmul.f32 %v1936_v31, %v626_v32  ;;  %v680_v32 = vunpack.c.h.bf16 %v306_v57 }
 0x3e3   :  { %v628_v38 = vpop.permute.xlu0 %627 }
 0x3e4   :  { %635 = vrot.lane.b32.xlu1 %v631_v33, %s2188_s2  ;;  %v632_v39 = vmul.f32 %v1938_v35, %v628_v38  ;;  %v681_v35 = vunpack.c.h.bf16 %v307_v58 }
 0x3e6   :  { %637 = vrot.lane.b32.xlu0 %v632_v39, %s2188_s2 }
 0x3e8   :  { %662 = vperm.xlu1 %1869, %v659_v34  }
 0x3ea   :  { %665 = vperm.xlu0 %1868, %v660_v40  }
 0x456   :  { %v636_v46 = vpop.permute.xlu1 %635 }
 0x457   :  { %v2466_v19 = vadd.f32 %v636_v46, %v621_v43 }
 0x458   :  { %v638_v48 = vpop.permute.xlu0 %637 }
 0x459   :  { %1939 = vtanh.f32 %v2466_v19  ;;  %v2476_v49 = vadd.f32 %v638_v48, %v622_v47 }
 0x45b   :  { %1941 = vtanh.f32 %v2476_v49 }
 0x45c   :  { %1943 = vpow2.f32 %v1763_v37 }
 0x45d   :  { %1945 = vpow2.f32 %v1765_v50 }
 0x463   :  { %v1940_v11 = vpop.eup %1939 }
 0x464   :  { %647 = vrot.lane.b32.xlu1 %v1940_v11, %s2188_s2 }
 0x465   :  { %v1942_v21 = vpop.eup %1941 }
 0x466   :  { %649 = vrot.lane.b32.xlu0 %v1942_v21, %s2188_s2  ;;  %v1944_v56 = vpop.eup %1943 }
 0x467   :  { %v1946_v60 = vpop.eup %1945  ;;  %v608_v61 = vadd.f32 1.0, %v1944_v56  ;;  %v2485_v2 = vpop.permute.xlu1 %662 }
 0x468   :  { %v610_v62 = vadd.f32 1.0, %v1946_v60  ;;  %vm667_vm9 = vcmp.eq.s32.totalorder %v2485_v2, 1 }
 0x469   :  { %1947 = vrcp.f32 %v608_v61  ;;  %v2487_v4 = vpop.permute.xlu0 %665  ;;  %v2530_v56 = vsel %vm667_vm9, %v2466_v19, %v2463_v42 }
 0x46a   :  { %1949 = vrcp.f32 %v610_v62  ;;  %vm668_vm10 = vcmp.eq.s32.totalorder %v2487_v4, 1 }
 0x46b   :  { %v2539_v61 = vsel %vm668_vm10, %v2476_v49, %v2472_v20  ;;  %v253_v20 = vpop.f32.mrb[12].mxu0 }
 0x46c   :  { %v254_v49 = vadd.f32 %v253_v20, %v2369_v27  ;;  %v255_v4 = vpop.f32.mrb[13].mxu0  ;;  %v1892_v20 = vld [vmem:[%s2978_s0 + $0x28] sm:$0xff]  }
 0x473   :  { %v1948_v7 = vpop.eup %1947 }
 0x474   :  { %v1950_v13 = vpop.eup %1949 }
 0x4d6   :  { %v648_v6 = vpop.permute.xlu1 %647 }
 0x4d7   :  { %v653_v9 = vmul.f32 %v1948_v7, %v648_v6 }
 0x4d8   :  { %v650_v15 = vpop.permute.xlu0 %649 }
 0x4d9   :  { %v654_v22 = vmul.f32 %v1950_v13, %v650_v15  ;;  %v2494_v23 = vsel %vm667_vm9, %v653_v9, %v2423_v44  ;;  %v678_v44 = vunpack.c.l.bf16 %v306_v57  ;;  %v256_v13 = vadd.f32 %v255_v4, %v2371_v29  ;;  %v257_v15 = vpop.f32.mrb[14].mxu0  ;;  %v1894_v4 = vld [vmem:[%s2978_s0 + $0x38] sm:$0xff]  }
 0x4db   :  { %v2499_v24 = vsel %vm668_vm10, %v654_v22, %v2428_v45  ;;  %v679_v45 = vunpack.c.l.bf16 %v307_v58  ;;  %v258_v22 = vadd.f32 %v257_v15, %v2369_v27 }
 0x4dc   :  { %v682_v26 = vpack.c.bf16 %v2499_v24, %v2494_v23 }
 0x4de   :  { %1768 = vmatmul.mubr.msk.bf16.vlgmr.msra.gmra.mrb[8].mxu1 %vm66_vm0, %v682_v26  ;;  %v259_v26 = vpop.f32.mrb[15].mxu0 }
 0x4df   :  { %825 = vmatpush1.bf16.msra.mxu1 %v2293_v5  ;;  %856 = vmatprep.mubr.bf16.mxu1 %v2190_v0 }
 0x4e0   :  { %826 = vmatprep.subr.bf16.mxu1 %v2299_v8 }
 0x4e3   :  { %827 = vmatpush1.bf16.msra.mxu1 %v2305_v10 }
 0x4e4   :  { %828 = vmatprep.subr.bf16.mxu1 %v2311_v12 }
 0x4e7   :  { %829 = vmatpush1.bf16.msra.mxu1 %v2320_v14 }
 0x4e8   :  { %830 = vmatprep.subr.bf16.mxu1 %v2326_v16 }
 0x4eb   :  { %831 = vmatpush1.bf16.msra.mxu1 %v2332_v18 }
 0x4ec   :  { %1100 = vmatprep.subr.bf16.mxu1 %v2288_v3 }
 0x5b1   :  { %v720_v28 = vpop.f32.mrb[8].mxu1 }
 0x5b2   :  { %v729_v30 = vadd.f32 %v720_v28, %v678_v44  ;;  %v722_v31 = vpop.f32.mrb[9].mxu1  ;;  %v260_v44 = vadd.f32 %v259_v26, %v2371_v29  ;;  %v308_v28 = vpack.c.bf16 %v258_v22, %v254_v49  ;;  %v1893_v49 = vld [vmem:[%s2978_s0 + $0x30] sm:$0xff]  }
 0x5b3   :  { %v730_v33 = vadd.f32 %v722_v31, %v679_v45  ;;  %v724_v34 = vpop.f32.mrb[10].mxu1 }
 0x5b4   :  { %v731_v38 = vadd.f32 %v724_v34, %v680_v32  ;;  %v726_v39 = vpop.f32.mrb[11].mxu1  ;;  %v1769_v46 = vmul.f32 -1.442695, %v729_v30  ;;  %v309_v30 = vpack.c.bf16 %v260_v44, %v256_v13 }
 0x5b5   :  { %1951 = vtanh.f32 %v730_v33  ;;  %v732_v40 = vadd.f32 %v726_v39, %v681_v35  ;;  %v1770_v2 = vmul.f32 -1.442695, %v730_v33 }
 0x5b6   :  { %v1771_v47 = vmul.f32 -1.442695, %v731_v38 }
 0x5b7   :  { %1953 = vtanh.f32 %v732_v40  ;;  %v1772_v9 = vmul.f32 -1.442695, %v732_v40 }
 0x5b8   :  { %1955 = vpow2.f32 %v1769_v46 }
 0x5b9   :  { %1957 = vpow2.f32 %v1771_v47 }
 0x5bf   :  { %v1952_v41 = vpop.eup %1951 }
 0x5c0   :  { %763 = vrot.lane.b32.xlu1 %v1952_v41, %s2188_s2 }
 0x5c1   :  { %v1954_v43 = vpop.eup %1953 }
 0x5c2   :  { %765 = vrot.lane.b32.xlu0 %v1954_v43, %s2188_s2  ;;  %v1956_v48 = vpop.eup %1955 }
 0x5c3   :  { %v745_v11 = vadd.f32 1.0, %v1956_v48  ;;  %v1958_v21 = vpop.eup %1957 }
 0x5c4   :  { %v747_v37 = vadd.f32 1.0, %v1958_v21 }
 0x5c5   :  { %1959 = vrcp.f32 %v745_v11 }
 0x5c6   :  { %1961 = vrcp.f32 %v747_v37 }
 0x5cf   :  { %v1960_v50 = vpop.eup %1959 }
 0x5d0   :  { %v1962_v51 = vpop.eup %1961  ;;  %v759_v57 = vmul.f32 %v1960_v50, %v2530_v56 }
 0x5d1   :  { %v760_v62 = vmul.f32 %v1962_v51, %v2539_v61 }
 0x632   :  { %v764_v17 = vpop.permute.xlu1 %763 }
 0x633   :  { %v769_v25 = vmul.f32 %v1960_v50, %v764_v17  ;;  %v818_v50 = vunpack.c.h.bf16 %v308_v28 }
 0x634   :  { %v766_v52 = vpop.permute.xlu0 %765 }
 0x635   :  { %773 = vrot.lane.b32.xlu1 %v769_v25, %s2188_s2  ;;  %v770_v53 = vmul.f32 %v1962_v51, %v766_v52  ;;  %v819_v25 = vunpack.c.h.bf16 %v309_v30 }
 0x637   :  { %775 = vrot.lane.b32.xlu0 %v770_v53, %s2188_s2 }
 0x639   :  { %800 = vperm.xlu1 %1869, %v797_v36  }
 0x63b   :  { %803 = vperm.xlu0 %1868, %v798_v54  }
 0x6a7   :  { %v774_v58 = vpop.permute.xlu1 %773 }
 0x6a8   :  { %v2533_v60 = vadd.f32 %v774_v58, %v759_v57 }
 0x6a9   :  { %v776_v6 = vpop.permute.xlu0 %775 }
 0x6aa   :  { %1963 = vtanh.f32 %v2533_v60  ;;  %v2543_v7 = vadd.f32 %v776_v6, %v760_v62  ;;  %v935_v62 = vsel %vm1780_vm15, 1, %v2190_v0 }
 0x6ac   :  { %1965 = vtanh.f32 %v2543_v7 }
 0x6ad   :  { %1967 = vpow2.f32 %v1770_v2  ;;  %v936_v2 = vsel %vm1781_vm1, 1, %v2190_v0 }
 0x6ae   :  { %1969 = vpow2.f32 %v1772_v9  ;;  %v1891_v9 = vld [vmem:[%s2978_s0 + $0x20] sm:$0xff]  }
 0x6af   :  { %1742 = vmatmul.mubr.msk.bf16.gmra.mrb[16].mxu0 %vm157_vm2, %v1891_v9 }
 0x6b0   :  { %271 = vmatprep.mubr.bf16.mxu0 %v2190_v0 }
 0x6b4   :  { %v1964_v42 = vpop.eup %1963 }
 0x6b5   :  { %785 = vrot.lane.b32.xlu1 %v1964_v42, %s2188_s2 }
 0x6b6   :  { %v1966_v19 = vpop.eup %1965 }
 0x6b7   :  { %787 = vrot.lane.b32.xlu0 %v1966_v19, %s2188_s2  ;;  %v1968_v45 = vpop.eup %1967  ;;  %1743 = vmatmul.mubr.msk.bf16.gmra.mrb[20].mxu0 %vm157_vm2, %v1892_v20 }
 0x6b8   :  { %v1970_v31 = vpop.eup %1969  ;;  %v746_v32 = vadd.f32 1.0, %v1968_v45  ;;  %v2552_v34 = vpop.permute.xlu1 %800  ;;  %281 = vmatprep.mubr.bf16.mxu0 %v2190_v0 }
 0x6b9   :  { %v748_v33 = vadd.f32 1.0, %v1970_v31  ;;  %vm805_vm13 = vcmp.eq.s32.totalorder %v2552_v34, 1 }
 0x6ba   :  { %1971 = vrcp.f32 %v746_v32  ;;  %v2554_v35 = vpop.permute.xlu0 %803  ;;  %v2612_v13 = vsel %vm805_vm13, %v2533_v60, %v2530_v56 }
 0x6bb   :  { %1973 = vrcp.f32 %v748_v33  ;;  %vm806_vm14 = vcmp.eq.s32.totalorder %v2554_v35, 1 }
 0x6bc   :  { %v2621_v44 = vsel %vm806_vm14, %v2543_v7, %v2539_v61 }
 0x6bf   :  { %1744 = vmatmul.mubr.msk.bf16.gmra.mrb[24].mxu0 %vm157_vm2, %v1893_v49 }
 0x6c0   :  { %291 = vmatprep.mubr.bf16.mxu0 %v2190_v0 }
 0x6c4   :  { %v1972_v39 = vpop.eup %1971 }
 0x6c5   :  { %v1974_v41 = vpop.eup %1973 }
 0x6c7   :  { %1745 = vmatmul.mubr.msk.bf16.gmra.mrb[28].mxu0 %vm157_vm2, %v1894_v4 }
 0x6c8   :  { %994 = vmatprep.mubr.bf16.mxu0 %v2190_v0 }
 0x727   :  { %v786_v38 = vpop.permute.xlu1 %785 }
 0x728   :  { %v791_v40 = vmul.f32 %v1972_v39, %v786_v38 }
 0x729   :  { %v788_v43 = vpop.permute.xlu0 %787 }
 0x72a   :  { %v792_v46 = vmul.f32 %v1974_v41, %v788_v43  ;;  %v2561_v47 = vsel %vm805_vm13, %v791_v40, %v2494_v23  ;;  %v816_v23 = vunpack.c.l.bf16 %v308_v28 }
 0x72c   :  { %v2566_v48 = vsel %vm806_vm14, %v792_v46, %v2499_v24  ;;  %v817_v24 = vunpack.c.l.bf16 %v309_v30 }
 0x72d   :  { %v820_v11 = vpack.c.bf16 %v2566_v48, %v2561_v47 }
 0x72f   :  { %1775 = vmatmul.mubr.msk.bf16.vlgmr.msra.gmra.mrb[12].mxu1 %vm66_vm0, %v820_v11 }
 0x730   :  { %1101 = vmatpush1.bf16.msra.mxu1 %v2293_v5  ;;  %1132 = vmatprep.mubr.bf16.mxu1 %v2190_v0 }
 0x731   :  { %1102 = vmatprep.subr.bf16.mxu1 %v2299_v8 }
 0x734   :  { %1103 = vmatpush1.bf16.msra.mxu1 %v2305_v10 }
 0x735   :  { %1104 = vmatprep.subr.bf16.mxu1 %v2311_v12 }
 0x738   :  { %1105 = vmatpush1.bf16.msra.mxu1 %v2320_v14 }
 0x739   :  { %1106 = vmatprep.subr.bf16.mxu1 %v2326_v16 }
 0x73c   :  { %1107 = vmatpush1.bf16.msra.mxu1 %v2332_v18 }
 0x73d   :  { %1376 = vmatprep.subr.bf16.mxu1 %v2288_v3 }
 0x782   :  { %v263_v61 = vpop.f32.mrb[16].mxu0 }
 0x783   :  { %v264_v7 = vadd.f32 %v263_v61, %v2369_v27  ;;  %v265_v33 = vpop.f32.mrb[17].mxu0 }
 0x784   :  { %v266_v34 = vadd.f32 %v265_v33, %v2371_v29  ;;  %v267_v35 = vpop.f32.mrb[18].mxu0 }
 0x785   :  { %v268_v38 = vadd.f32 %v267_v35, %v2369_v27  ;;  %v269_v39 = vpop.f32.mrb[19].mxu0  ;;  %v2715_v35 = vld [vmem:[%s2981_s3 + $0x34] ss:$8 sps:$4 sm:$0xff]  }
 0x786   :  { %v270_v40 = vadd.f32 %v269_v39, %v2371_v29 }
 0x787   :  { %v2634_v43 = vpack.c.bf16 %v268_v38, %v264_v7  ;;  %v2721_v38 = vld [vmem:[%s2981_s3 + $0x30] ss:$8 sps:$4 sm:$0xff]  }
 0x788   :  { %v2636_v46 = vpack.c.bf16 %v270_v40, %v266_v34  ;;  %v2709_v34 = vld [vmem:[%s2981_s3 + $0x20] ss:$8 sps:$4 sm:$0xff]  }
 0x789   :  { %v954_v39 = vunpack.c.l.bf16 %v2634_v43 }
 0x802   :  { %v858_v21 = vpop.f32.mrb[12].mxu1 }
 0x803   :  { %v867_v5 = vadd.f32 %v858_v21, %v816_v23  ;;  %v860_v37 = vpop.f32.mrb[13].mxu1 }
 0x804   :  { %v868_v17 = vadd.f32 %v860_v37, %v817_v24  ;;  %v862_v8 = vpop.f32.mrb[14].mxu1  ;;  %v273_v24 = vpop.f32.mrb[20].mxu0 }
 0x805   :  { %v869_v10 = vadd.f32 %v862_v8, %v818_v50  ;;  %v864_v36 = vpop.f32.mrb[15].mxu1  ;;  %v1776_v3 = vmul.f32 -1.442695, %v867_v5  ;;  %v274_v21 = vadd.f32 %v273_v24, %v2369_v27  ;;  %v275_v5 = vpop.f32.mrb[21].mxu0  ;;  %v956_v24 = vunpack.c.h.bf16 %v2634_v43 }
 0x806   :  { %1975 = vtanh.f32 %v868_v17  ;;  %v870_v12 = vadd.f32 %v864_v36, %v819_v25  ;;  %v1777_v31 = vmul.f32 -1.442695, %v868_v17  ;;  %v276_v50 = vadd.f32 %v275_v5, %v2371_v29  ;;  %v277_v17 = vpop.f32.mrb[22].mxu0 }
 0x807   :  { %v1778_v18 = vmul.f32 -1.442695, %v869_v10  ;;  %v278_v8 = vadd.f32 %v277_v17, %v2369_v27  ;;  %v279_v25 = vpop.f32.mrb[23].mxu0 }
 0x808   :  { %1977 = vtanh.f32 %v870_v12  ;;  %v1779_v32 = vmul.f32 -1.442695, %v870_v12  ;;  %v280_v10 = vadd.f32 %v279_v25, %v2371_v29 }
 0x809   :  { %1979 = vpow2.f32 %v1776_v3  ;;  %v2642_v36 = vpack.c.bf16 %v278_v8, %v274_v21 }
 0x80a   :  { %1981 = vpow2.f32 %v1778_v18  ;;  %v2644_v12 = vpack.c.bf16 %v280_v10, %v276_v50 }
 0x810   :  { %v1976_v14 = vpop.eup %1975 }
 0x811   :  { %901 = vrot.lane.b32.xlu1 %v1976_v14, %s2188_s2 }
 0x812   :  { %v1978_v16 = vpop.eup %1977 }
 0x813   :  { %903 = vrot.lane.b32.xlu0 %v1978_v16, %s2188_s2  ;;  %v1980_v51 = vpop.eup %1979  ;;  %v283_v16 = vpop.f32.mrb[24].mxu0 }
 0x814   :  { %v883_v52 = vadd.f32 1.0, %v1980_v51  ;;  %v1982_v53 = vpop.eup %1981  ;;  %v284_v3 = vadd.f32 %v283_v16, %v2369_v27  ;;  %v285_v18 = vpop.f32.mrb[25].mxu0 }
 0x815   :  { %v885_v54 = vadd.f32 1.0, %v1982_v53  ;;  %v286_v51 = vadd.f32 %v285_v18, %v2371_v29 }
 0x816   :  { %1983 = vrcp.f32 %v883_v52  ;;  %v287_v52 = vpop.f32.mrb[26].mxu0 }
 0x817   :  { %1985 = vrcp.f32 %v885_v54  ;;  %v288_v53 = vadd.f32 %v287_v52, %v2369_v27  ;;  %v289_v54 = vpop.f32.mrb[27].mxu0 }
 0x818   :  { %v293_v20 = vpop.f32.mrb[28].mxu0 }
 0x819   :  { %v294_v4 = vadd.f32 %v293_v20, %v2369_v27 }
 0x820   :  { %v1984_v55 = vpop.eup %1983 }
 0x821   :  { %v1986_v6 = vpop.eup %1985  ;;  %v897_v15 = vmul.f32 %v1984_v55, %v2612_v13 }
 0x822   :  { %v898_v45 = vmul.f32 %v1986_v6, %v2621_v44 }
 0x883   :  { %v902_v57 = vpop.permute.xlu1 %901 }
 0x884   :  { %v907_v58 = vmul.f32 %v1984_v55, %v902_v57 }
 0x885   :  { %v904_v42 = vpop.permute.xlu0 %903 }
 0x886   :  { %911 = vrot.lane.b32.xlu1 %v907_v58, %s2188_s2  ;;  %v908_v19 = vmul.f32 %v1986_v6, %v904_v42  ;;  %v290_v58 = vadd.f32 %v289_v54, %v2371_v29 }
 0x888   :  { %913 = vrot.lane.b32.xlu0 %v908_v19, %s2188_s2  ;;  %v2656_v42 = vpack.c.bf16 %v290_v58, %v286_v51 }
 0x88a   :  { %938 = vperm.xlu1 %1869, %v935_v62   ;;  %v2654_v62 = vpack.c.bf16 %v288_v53, %v284_v3 }
 0x88c   :  { %941 = vperm.xlu0 %1868, %v936_v2  }
 0x8f8   :  { %v912_v22 = vpop.permute.xlu1 %911 }
 0x8f9   :  { %v2615_v26 = vadd.f32 %v912_v22, %v897_v15  ;;  %v295_v15 = vpop.f32.mrb[29].mxu0 }
 0x8fa   :  { %v914_v28 = vpop.permute.xlu0 %913  ;;  %v296_v22 = vadd.f32 %v295_v15, %v2371_v29 }
 0x8fb   :  { %1987 = vtanh.f32 %v2615_v26  ;;  %v2625_v30 = vadd.f32 %v914_v28, %v898_v45  ;;  %v297_v45 = vpop.f32.mrb[30].mxu0 }
 0x8fd   :  { %1989 = vtanh.f32 %v2625_v30 }
 0x8fe   :  { %1991 = vpow2.f32 %v1777_v31  ;;  %v299_v31 = vpop.f32.mrb[31].mxu0 }
 0x8ff   :  { %1993 = vpow2.f32 %v1779_v32  ;;  %v300_v61 = vadd.f32 %v299_v31, %v2371_v29  ;;  %v2697_v29 = vld [vmem:[%s2981_s3 + $0x10] ss:$8 sps:$4 sm:$0xff]  }
 0x901   :  { %v2679_v33 = vpack.c.bf16 %v300_v61, %v296_v22 }
 0x905   :  { %v1988_v56 = vpop.eup %1987 }
 0x906   :  { %923 = vrot.lane.b32.xlu1 %v1988_v56, %s2188_s2 }
 0x907   :  { %v1990_v60 = vpop.eup %1989 }
 0x908   :  { %925 = vrot.lane.b32.xlu0 %v1990_v60, %s2188_s2  ;;  %v1992_v41 = vpop.eup %1991  ;;  %v298_v60 = vadd.f32 %v297_v45, %v2369_v27  ;;  %v2691_v27 = vld [vmem:[%s2981_s3 + $0x14] ss:$8 sps:$4 sm:$0xff]  }
 0x909   :  { %v1994_v11 = vpop.eup %1993  ;;  %v884_v23 = vadd.f32 1.0, %v1992_v41  ;;  %v2646_v14 = vpop.permute.xlu1 %938  ;;  %v955_v41 = vunpack.c.l.bf16 %v2636_v46 }
 0x90a   :  { %v886_v37 = vadd.f32 1.0, %v1994_v11  ;;  %vm943_vm2 = vcmp.eq.s32.totalorder %v2646_v14, 1  ;;  %v2676_v7 = vpack.c.bf16 %v298_v60, %v294_v4 }
 0x90b   :  { %1995 = vrcp.f32 %v884_v23  ;;  %v2651_v55 = vpop.permute.xlu0 %941  ;;  %v2741_v59 = vsel %vm943_vm2, %v2615_v26, %v2612_v13 }
 0x90c   :  { %1997 = vrcp.f32 %v886_v37  ;;  %vm944_vm3 = vcmp.eq.s32.totalorder %v2651_v55, 1  ;;  %v957_v37 = vunpack.c.h.bf16 %v2636_v46 }
 0x90d   :  { %v2750_v63 = vsel %vm944_vm3, %v2625_v30, %v2621_v44 }
 0x915   :  { %v1996_v6 = vpop.eup %1995 }
 0x916   :  { %v1998_v2 = vpop.eup %1997 }
 0x978   :  { %v924_v57 = vpop.permute.xlu1 %923 }
 0x979   :  { %v929_v19 = vmul.f32 %v1996_v6, %v924_v57  ;;  %v1073_v57 = vsel %vm1787_vm4, 1, %v2190_v0 }
 0x97a   :  { %v926_v9 = vpop.permute.xlu0 %925 }
 0x97b   :  { %v930_v49 = vmul.f32 %v1998_v2, %v926_v9  ;;  %v2665_v28 = vsel %vm943_vm2, %v929_v19, %v2561_v47  ;;  %v2684_v47 = vld [vmem:[%s2981_s3] ss:$8 sps:$4 sm:$0xff]   ;;  %v1074_v2 = vsel %vm1788_vm5, 1, %v2190_v0 }
 0x97d   :  { %v2670_v56 = vsel %vm944_vm3, %v930_v49, %v2566_v48  ;;  %v2703_v48 = vld [vmem:[%s2981_s3 + $0x24] ss:$8 sps:$4 sm:$0xff]   ;;  %vm2192_vm3 = vmmov 0  }
 0x97e   :  { %v958_v32 = vpack.c.bf16 %v2670_v56, %v2665_v28 }
 0x980   :  { %1782 = vmatmul.mubr.msk.bf16.vlgmr.msra.gmra.mrb[32].mxu0 %vm66_vm0, %v958_v32 }
 0x981   :  { %1239 = vmatpush1.bf16.msra.mxu0 %v2684_v47  ;;  %1270 = vmatprep.mubr.bf16.mxu0 %v2190_v0 }
 0x982   :  { %1240 = vmatprep.subr.bf16.mxu0 %v2691_v27 }
 0x985   :  { %1241 = vmatpush1.bf16.msra.mxu0 %v2697_v29 }
 0x986   :  { %1242 = vmatprep.subr.bf16.mxu0 %v2703_v48 }
 0x989   :  { %1243 = vmatpush1.bf16.msra.mxu0 %v2709_v34 }
 0x98a   :  { %1244 = vmatprep.subr.bf16.mxu0 %v2715_v35 }
 0x98d   :  { %1245 = vmatpush1.bf16.msra.mxu0 %v2721_v38 }
 0x98e   :  { %1834 = vmatprep.subr.bf16.mxu0 %v2191_v1 }
 0xa53   :  { %v996_v40 = vpop.f32.mrb[32].mxu0 }
 0xa54   :  { %v1005_v11 = vadd.f32 %v996_v40, %v954_v39  ;;  %v998_v23 = vpop.f32.mrb[33].mxu0 }
 0xa55   :  { %v1006_v21 = vadd.f32 %v998_v23, %v955_v41  ;;  %v1000_v5 = vpop.f32.mrb[34].mxu0 }
 0xa56   :  { %v1007_v50 = vadd.f32 %v1000_v5, %v956_v24  ;;  %v1002_v17 = vpop.f32.mrb[35].mxu0  ;;  %v1783_v16 = vmul.f32 -1.442695, %v1005_v11 }
 0xa57   :  { %1999 = vtanh.f32 %v1006_v21  ;;  %v1008_v8 = vadd.f32 %v1002_v17, %v957_v37  ;;  %v1784_v14 = vmul.f32 -1.442695, %v1006_v21 }
 0xa58   :  { %v1785_v3 = vmul.f32 -1.442695, %v1007_v50 }
 0xa59   :  { %2001 = vtanh.f32 %v1008_v8  ;;  %v1786_v45 = vmul.f32 -1.442695, %v1008_v8 }
 0xa5a   :  { %2003 = vpow2.f32 %v1783_v16 }
 0xa5b   :  { %2005 = vpow2.f32 %v1785_v3 }
 0xa61   :  { %v2000_v25 = vpop.eup %1999 }
 0xa62   :  { %1039 = vrot.lane.b32.xlu1 %v2000_v25, %s2188_s2 }
 0xa63   :  { %v2002_v10 = vpop.eup %2001 }
 0xa64   :  { %1041 = vrot.lane.b32.xlu0 %v2002_v10, %s2188_s2  ;;  %v2004_v43 = vpop.eup %2003 }
 0xa65   :  { %v1021_v18 = vadd.f32 1.0, %v2004_v43  ;;  %v2006_v51 = vpop.eup %2005 }
 0xa66   :  { %v1023_v46 = vadd.f32 1.0, %v2006_v51 }
 0xa67   :  { %2007 = vrcp.f32 %v1021_v18 }
 0xa68   :  { %2009 = vrcp.f32 %v1023_v46 }
 0xa71   :  { %v2008_v52 = vpop.eup %2007 }
 0xa72   :  { %v2010_v58 = vpop.eup %2009  ;;  %v1035_v9 = vmul.f32 %v2008_v52, %v2741_v59 }
 0xa73   :  { %v1036_v4 = vmul.f32 %v2010_v58, %v2750_v63 }
 0xad4   :  { %v1040_v53 = vpop.permute.xlu1 %1039 }
 0xad5   :  { %v1045_v54 = vmul.f32 %v2008_v52, %v1040_v53  ;;  %v2796_v52 = vld [vmem:[%s2979_s1] sm:$0xff] }
 0xad6   :  { %v1042_v6 = vpop.permute.xlu0 %1041  ;;  %vm1794_vm8 = vcmp.gt.s32.totalorder %v2796_v52, 5  ;;  %vm1801_vm12 = vcmp.gt.s32.totalorder %v2796_v52, 6  ;;  %vm1808_vm1 = vcmp.gt.s32.totalorder %v2796_v52, 7  ;;  %v1896_v52 = vld [vmem:[%s2983_s5 + $0x8] sm:$0xff]  }
 0xad7   :  { %1049 = vrot.lane.b32.xlu1 %v1045_v54, %s2188_s2  ;;  %v1046_v19 = vmul.f32 %v2010_v58, %v1042_v6  ;;  %v1211_v53 = vsel %vm1794_vm8, 1, %v2190_v0  ;;  %v2804_v6 = vld [vmem:[%s2979_s1 + $0x8] sm:$0xff] }
 0xad8   :  { %vm1795_vm9 = vcmp.gt.s32.totalorder %v2804_v6, 5  ;;  %vm1802_vm13 = vcmp.gt.s32.totalorder %v2804_v6, 6  ;;  %vm1809_vm2 = vcmp.gt.s32.totalorder %v2804_v6, 7 }
 0xad9   :  { %1051 = vrot.lane.b32.xlu0 %v1046_v19, %s2188_s2  ;;  %v1212_v19 = vsel %vm1795_vm9, 1, %v2190_v0 }
 0xadb   :  { %1076 = vperm.xlu1 %1869, %v1073_v57  }
 0xadd   :  { %1079 = vperm.xlu0 %1868, %v1074_v2  }
 0xb49   :  { %v1050_v20 = vpop.permute.xlu1 %1049 }
 0xb4a   :  { %v2744_v49 = vadd.f32 %v1050_v20, %v1035_v9 }
 0xb4b   :  { %v1052_v15 = vpop.permute.xlu0 %1051 }
 0xb4c   :  { %2011 = vtanh.f32 %v2744_v49  ;;  %v2754_v22 = vadd.f32 %v1052_v15, %v1036_v4 }
 0xb4e   :  { %2013 = vtanh.f32 %v2754_v22 }
 0xb4f   :  { %2015 = vpow2.f32 %v1784_v14 }
 0xb50   :  { %2017 = vpow2.f32 %v1786_v45 }
 0xb56   :  { %v2012_v13 = vpop.eup %2011 }
 0xb57   :  { %1061 = vrot.lane.b32.xlu1 %v2012_v13, %s2188_s2 }
 0xb58   :  { %v2014_v26 = vpop.eup %2013 }
 0xb59   :  { %1063 = vrot.lane.b32.xlu0 %v2014_v26, %s2188_s2  ;;  %v2016_v44 = vpop.eup %2015 }
 0xb5a   :  { %v2018_v30 = vpop.eup %2017  ;;  %v1022_v55 = vadd.f32 1.0, %v2016_v44  ;;  %v2759_v31 = vpop.permute.xlu1 %1076 }
 0xb5b   :  { %v1024_v60 = vadd.f32 1.0, %v2018_v30  ;;  %vm1081_vm6 = vcmp.eq.s32.totalorder %v2759_v31, 1 }
 0xb5c   :  { %2019 = vrcp.f32 %v1022_v55  ;;  %v2761_v32 = vpop.permute.xlu0 %1079  ;;  %v2813_v2 = vsel %vm1081_vm6, %v2744_v49, %v2741_v59 }
 0xb5d   :  { %2021 = vrcp.f32 %v1024_v60  ;;  %vm1082_vm7 = vcmp.eq.s32.totalorder %v2761_v32, 1 }
 0xb5e   :  { %v2822_v15 = vsel %vm1082_vm7, %v2754_v22, %v2750_v63 }
 0xb66   :  { %v2020_v39 = vpop.eup %2019 }
 0xb67   :  { %v2022_v41 = vpop.eup %2021 }
 0xbc9   :  { %v1062_v61 = vpop.permute.xlu1 %1061 }
 0xbca   :  { %v1067_v40 = vmul.f32 %v2020_v39, %v1062_v61 }
 0xbcb   :  { %v1064_v11 = vpop.permute.xlu0 %1063 }
 0xbcc   :  { %v1068_v23 = vmul.f32 %v2022_v41, %v1064_v11  ;;  %v2768_v24 = vsel %vm1081_vm6, %v1067_v40, %v2665_v28  ;;  %v1092_v28 = vunpack.c.l.bf16 %v2642_v36 }
 0xbce   :  { %v2773_v21 = vsel %vm1082_vm7, %v1068_v23, %v2670_v56 }
 0xbcf   :  { %v1096_v5 = vpack.c.bf16 %v2773_v21, %v2768_v24 }
 0xbd1   :  { %1789 = vmatmul.mubr.msk.bf16.vlgmr.msra.gmra.mrb[16].mxu1 %vm66_vm0, %v1096_v5 }
 0xbd2   :  { %1377 = vmatpush1.bf16.msra.mxu1 %v2684_v47  ;;  %1408 = vmatprep.mubr.bf16.mxu1 %v2190_v0  ;;  %v1093_v47 = vunpack.c.l.bf16 %v2644_v12 }
 0xbd3   :  { %1378 = vmatprep.subr.bf16.mxu1 %v2691_v27  ;;  %v1094_v27 = vunpack.c.h.bf16 %v2642_v36 }
 0xbd6   :  { %1379 = vmatpush1.bf16.msra.mxu1 %v2697_v29 }
 0xbd7   :  { %1380 = vmatprep.subr.bf16.mxu1 %v2703_v48  ;;  %v1095_v48 = vunpack.c.h.bf16 %v2644_v12 }
 0xbda   :  { %1381 = vmatpush1.bf16.msra.mxu1 %v2709_v34 }
 0xbdb   :  { %1382 = vmatprep.subr.bf16.mxu1 %v2715_v35 }
 0xbde   :  { %1383 = vmatpush1.bf16.msra.mxu1 %v2721_v38 }
 0xbdf   :  { %1846 = vmatprep.subr.bf16.mxu1 %v2191_v1 }
 0xca4   :  { %v1134_v56 = vpop.f32.mrb[16].mxu1 }
 0xca5   :  { %v1143_v37 = vadd.f32 %v1134_v56, %v1092_v28  ;;  %v1136_v50 = vpop.f32.mrb[17].mxu1  ;;  %v1230_v56 = vunpack.c.l.bf16 %v2654_v62 }
 0xca6   :  { %v1144_v29 = vadd.f32 %v1136_v50, %v1093_v47  ;;  %v1138_v17 = vpop.f32.mrb[18].mxu1 }
 0xca7   :  { %v1145_v34 = vadd.f32 %v1138_v17, %v1094_v27  ;;  %v1140_v8 = vpop.f32.mrb[19].mxu1  ;;  %v1790_v10 = vmul.f32 -1.442695, %v1143_v37  ;;  %v1231_v37 = vunpack.c.l.bf16 %v2656_v42 }
 0xca8   :  { %2023 = vtanh.f32 %v1144_v29  ;;  %v1146_v35 = vadd.f32 %v1140_v8, %v1095_v48  ;;  %v1791_v45 = vmul.f32 -1.442695, %v1144_v29  ;;  %v1232_v29 = vunpack.c.h.bf16 %v2654_v62 }
 0xca9   :  { %v1792_v16 = vmul.f32 -1.442695, %v1145_v34  ;;  %v1233_v48 = vunpack.c.h.bf16 %v2656_v42 }
 0xcaa   :  { %2025 = vtanh.f32 %v1146_v35  ;;  %v1793_v44 = vmul.f32 -1.442695, %v1146_v35 }
 0xcab   :  { %2027 = vpow2.f32 %v1790_v10 }
 0xcac   :  { %2029 = vpow2.f32 %v1792_v16 }
 0xcb2   :  { %v2024_v38 = vpop.eup %2023 }
 0xcb3   :  { %1177 = vrot.lane.b32.xlu1 %v2024_v38, %s2188_s2 }
 0xcb4   :  { %v2026_v25 = vpop.eup %2025 }
 0xcb5   :  { %1179 = vrot.lane.b32.xlu0 %v2026_v25, %s2188_s2  ;;  %v2028_v36 = vpop.eup %2027 }
 0xcb6   :  { %v1159_v3 = vadd.f32 1.0, %v2028_v36  ;;  %v2030_v43 = vpop.eup %2029 }
 0xcb7   :  { %v1161_v12 = vadd.f32 1.0, %v2030_v43 }
 0xcb8   :  { %2031 = vrcp.f32 %v1159_v3 }
 0xcb9   :  { %2033 = vrcp.f32 %v1161_v12 }
 0xcc2   :  { %v2032_v18 = vpop.eup %2031 }
 0xcc3   :  { %v2034_v54 = vpop.eup %2033  ;;  %v1173_v9 = vmul.f32 %v2032_v18, %v2813_v2 }
 0xcc4   :  { %v1174_v13 = vmul.f32 %v2034_v54, %v2822_v15 }
 0xd25   :  { %v1178_v51 = vpop.permute.xlu1 %1177 }
 0xd26   :  { %v1183_v46 = vmul.f32 %v2032_v18, %v1178_v51  ;;  %v1349_v18 = vsel %vm1801_vm12, 1, %v2190_v0 }
 0xd27   :  { %v1180_v57 = vpop.permute.xlu0 %1179 }
 0xd28   :  { %1187 = vrot.lane.b32.xlu1 %v1183_v46, %s2188_s2  ;;  %v1184_v58 = vmul.f32 %v2034_v54, %v1180_v57  ;;  %v1350_v54 = vsel %vm1802_vm13, 1, %v2190_v0 }
 0xd2a   :  { %1189 = vrot.lane.b32.xlu0 %v1184_v58, %s2188_s2 }
 0xd2c   :  { %1214 = vperm.xlu1 %1869, %v1211_v53  }
 0xd2e   :  { %1217 = vperm.xlu0 %1868, %v1212_v19  }
 0xd9a   :  { %v1188_v20 = vpop.permute.xlu1 %1187 }
 0xd9b   :  { %v2816_v4 = vadd.f32 %v1188_v20, %v1173_v9 }
 0xd9c   :  { %v1190_v26 = vpop.permute.xlu0 %1189 }
 0xd9d   :  { %2035 = vtanh.f32 %v2816_v4  ;;  %v2826_v14 = vadd.f32 %v1190_v26, %v1174_v13 }
 0xd9f   :  { %2037 = vtanh.f32 %v2826_v14 }
 0xda0   :  { %2039 = vpow2.f32 %v1791_v45 }
 0xda1   :  { %2041 = vpow2.f32 %v1793_v44 }
 0xda7   :  { %v2036_v59 = vpop.eup %2035 }
 0xda8   :  { %1199 = vrot.lane.b32.xlu1 %v2036_v59, %s2188_s2 }
 0xda9   :  { %v2038_v49 = vpop.eup %2037 }
 0xdaa   :  { %1201 = vrot.lane.b32.xlu0 %v2038_v49, %s2188_s2  ;;  %v2040_v63 = vpop.eup %2039 }
 0xdab   :  { %v2042_v22 = vpop.eup %2041  ;;  %v1160_v30 = vadd.f32 1.0, %v2040_v63  ;;  %v1215_v60 = vpop.permute.xlu1 %1214 }
 0xdac   :  { %v1162_v55 = vadd.f32 1.0, %v2042_v22  ;;  %vm1219_vm10 = vcmp.eq.s32.totalorder %v1215_v60, 1 }
 0xdad   :  { %2043 = vrcp.f32 %v1160_v30  ;;  %v1218_v31 = vpop.permute.xlu0 %1217  ;;  %v2857_v57 = vsel %vm1219_vm10, %v2816_v4, %v2813_v2 }
 0xdae   :  { %2045 = vrcp.f32 %v1162_v55  ;;  %vm1220_vm11 = vcmp.eq.s32.totalorder %v1218_v31, 1 }
 0xdaf   :  { %v2865_v20 = vsel %vm1220_vm11, %v2826_v14, %v2822_v15 }
 0xdb7   :  { %v2044_v61 = vpop.eup %2043 }
 0xdb8   :  { %v2046_v40 = vpop.eup %2045 }
 0xe1a   :  { %v1200_v32 = vpop.permute.xlu1 %1199 }
 0xe1b   :  { %v1205_v39 = vmul.f32 %v2044_v61, %v1200_v32 }
 0xe1c   :  { %v1202_v41 = vpop.permute.xlu0 %1201 }
 0xe1d   :  { %v1206_v11 = vmul.f32 %v2046_v40, %v1202_v41  ;;  %v2833_v23 = vsel %vm1219_vm10, %v1205_v39, %v2768_v24 }
 0xe1f   :  { %v2837_v5 = vsel %vm1220_vm11, %v1206_v11, %v2773_v21 }
 0xe20   :  { %v1234_v28 = vpack.c.bf16 %v2837_v5, %v2833_v23 }
 0xe22   :  { %1796 = vmatmul.mubr.msk.bf16.vlgmr.msra.gmra.mrb[36].mxu0 %vm66_vm0, %v1234_v28  ;;  %v1368_v28 = vunpack.c.l.bf16 %v2676_v7 }
 0xe23   :  { %1842 = vmatprep.mubr.msk.bf16.mxu0 %vm2192_vm3, %v2191_v1 }
 0xef5   :  { %v1272_v47 = vpop.f32.mrb[36].mxu0 }
 0xef6   :  { %v1281_v50 = vadd.f32 %v1272_v47, %v1230_v56  ;;  %v1274_v27 = vpop.f32.mrb[37].mxu0  ;;  %v1369_v47 = vunpack.c.l.bf16 %v2679_v33 }
 0xef7   :  { %v1282_v24 = vadd.f32 %v1274_v27, %v1231_v37  ;;  %v1276_v17 = vpop.f32.mrb[38].mxu0 }
 0xef8   :  { %v1283_v21 = vadd.f32 %v1276_v17, %v1232_v29  ;;  %v1278_v34 = vpop.f32.mrb[39].mxu0  ;;  %v1797_v25 = vmul.f32 -1.442695, %v1281_v50 }
 0xef9   :  { %2047 = vtanh.f32 %v1282_v24  ;;  %v1284_v8 = vadd.f32 %v1278_v34, %v1233_v48  ;;  %v1798_v49 = vmul.f32 -1.442695, %v1282_v24 }
 0xefa   :  { %v1799_v10 = vmul.f32 -1.442695, %v1283_v21 }
 0xefb   :  { %2049 = vtanh.f32 %v1284_v8  ;;  %v1800_v45 = vmul.f32 -1.442695, %v1284_v8 }
 0xefc   :  { %2051 = vpow2.f32 %v1797_v25 }
 0xefd   :  { %2053 = vpow2.f32 %v1799_v10 }
 0xf03   :  { %v2048_v35 = vpop.eup %2047 }
 0xf04   :  { %1315 = vrot.lane.b32.xlu1 %v2048_v35, %s2188_s2 }
 0xf05   :  { %v2050_v38 = vpop.eup %2049 }
 0xf06   :  { %1317 = vrot.lane.b32.xlu0 %v2050_v38, %s2188_s2  ;;  %v2052_v62 = vpop.eup %2051 }
 0xf07   :  { %v1297_v16 = vadd.f32 1.0, %v2052_v62  ;;  %v2054_v36 = vpop.eup %2053 }
 0xf08   :  { %v1299_v42 = vadd.f32 1.0, %v2054_v36  ;;  %v1487_v36 = vsel %vm1808_vm1, 1, %v2190_v0 }
 0xf09   :  { %2055 = vrcp.f32 %v1297_v16 }
 0xf0a   :  { %2057 = vrcp.f32 %v1299_v42 }
 0xf13   :  { %v2056_v3 = vpop.eup %2055 }
 0xf14   :  { %v2058_v51 = vpop.eup %2057  ;;  %v1311_v58 = vmul.f32 %v2056_v3, %v2857_v57 }
 0xf15   :  { %v1312_v13 = vmul.f32 %v2058_v51, %v2865_v20 }
 0xf76   :  { %v1316_v43 = vpop.permute.xlu1 %1315 }
 0xf77   :  { %v1321_v12 = vmul.f32 %v2056_v3, %v1316_v43 }
 0xf78   :  { %v1318_v46 = vpop.permute.xlu0 %1317 }
 0xf79   :  { %1325 = vrot.lane.b32.xlu1 %v1321_v12, %s2188_s2  ;;  %v1322_v53 = vmul.f32 %v2058_v51, %v1318_v46  ;;  %v1488_v12 = vsel %vm1809_vm2, 1, %v2190_v0 }
 0xf7b   :  { %1327 = vrot.lane.b32.xlu0 %v1322_v53, %s2188_s2  ;;  %v1897_v53 = vld [vmem:[%s2983_s5 + $0x10] sm:$0xff]  }
 0xf7d   :  { %1352 = vperm.xlu1 %1869, %v1349_v18   ;;  %v1895_v18 = vld [vmem:[%s2983_s5] sm:$0xff]  }
 0xf7e   :  { %1835 = vmatpush3.bf16.msra.mxu0 %v1895_v18 }
 0xf7f   :  { %1355 = vperm.xlu0 %1868, %v1350_v54   ;;  %1836 = vmatprep.subr.bf16.mxu0 %v2191_v1 }
 0xf82   :  { %1837 = vmatpush3.bf16.msra.mxu0 %v1896_v52 }
 0xf83   :  { %1838 = vmatprep.subr.bf16.mxu0 %v2191_v1 }
 0xf86   :  { %1839 = vmatpush3.bf16.msra.mxu0 %v1897_v53 }
 0xf87   :  { %1840 = vmatprep.subr.bf16.mxu0 %v2191_v1 }
 0xfeb   :  { %v1326_v19 = vpop.permute.xlu1 %1325 }
 0xfec   :  { %v2860_v9 = vadd.f32 %v1326_v19, %v1311_v58 }
 0xfed   :  { %v1328_v26 = vpop.permute.xlu0 %1327 }
 0xfee   :  { %2059 = vtanh.f32 %v2860_v9  ;;  %v2869_v59 = vadd.f32 %v1328_v26, %v1312_v13  ;;  %v1900_v26 = vld [vmem:[#allocation8 + $0x8] sm:$0xff]  }
 0xff0   :  { %2061 = vtanh.f32 %v2869_v59 }
 0xff1   :  { %2063 = vpow2.f32 %v1798_v49 }
 0xff2   :  { %2065 = vpow2.f32 %v1800_v45 }
 0xff8   :  { %v2060_v2 = vpop.eup %2059 }
 0xff9   :  { %1337 = vrot.lane.b32.xlu1 %v2060_v2, %s2188_s2 }
 0xffa   :  { %v2062_v4 = vpop.eup %2061 }
 0xffb   :  { %1339 = vrot.lane.b32.xlu0 %v2062_v4, %s2188_s2  ;;  %v2064_v15 = vpop.eup %2063 }
 0xffc   :  { %v2066_v14 = vpop.eup %2065  ;;  %v1298_v44 = vadd.f32 1.0, %v2064_v15  ;;  %v2874_v22 = vpop.permute.xlu1 %1352 }
 0xffd   :  { %v1300_v63 = vadd.f32 1.0, %v2066_v14  ;;  %vm1357_vm14 = vcmp.eq.s32.totalorder %v2874_v22, 1 }
 0xffe   :  { %2067 = vrcp.f32 %v1298_v44  ;;  %v2876_v30 = vpop.permute.xlu0 %1355  ;;  %v1361_v0 = vsel %vm1357_vm14, %v2860_v9, %v2857_v57  ;;  %v1898_v57 = vld [vmem:[%s2983_s5 + $0x18] sm:$0xff]  }
 0xfff   :  { %2069 = vrcp.f32 %v1300_v63  ;;  %vm1358_vm15 = vcmp.eq.s32.totalorder %v2876_v30, 1  ;;  %1841 = vmatpush3.bf16.msra.mxu0 %v1898_v57  ;;  %v1899_v9 = vld [vmem:[#allocation8] sm:$0xff]  }
0x1000   :  { %v1362_v54 = vsel %vm1358_vm15, %v2869_v59, %v2865_v20 }
0x1008   :  { %v2068_v60 = vpop.eup %2067 }
0x1009   :  { %v2070_v32 = vpop.eup %2069 }
0x106b   :  { %v1338_v55 = vpop.permute.xlu1 %1337 }
0x106c   :  { %v1343_v31 = vmul.f32 %v2068_v60, %v1338_v55 }
0x106d   :  { %v1340_v61 = vpop.permute.xlu0 %1339 }
0x106e   :  { %v1344_v39 = vmul.f32 %v2070_v32, %v1340_v61  ;;  %v2883_v40 = vsel %vm1357_vm14, %v1343_v31, %v2833_v23  ;;  %v1370_v23 = vunpack.c.h.bf16 %v2676_v7 }
0x1070   :  { %v2888_v41 = vsel %vm1358_vm15, %v1344_v39, %v2837_v5  ;;  %v1371_v5 = vunpack.c.h.bf16 %v2679_v33 }
0x1071   :  { %v1372_v11 = vpack.c.bf16 %v2888_v41, %v2883_v40 }
0x1073   :  { %1803 = vmatmul.mubr.msk.bf16.vlgmr.msra.gmra.mrb[20].mxu1 %vm66_vm0, %v1372_v11 }
0x1074   :  { %1854 = vmatprep.mubr.msk.bf16.mxu1 %vm2192_vm3, %v2191_v1  ;;  %1847 = vmatpush3.bf16.msra.mxu1 %v1899_v9 }
0x1075   :  { %1848 = vmatprep.subr.bf16.mxu1 %v2191_v1 }
0x1078   :  { %1849 = vmatpush3.bf16.msra.mxu1 %v1900_v26 }
0x1079   :  { %1850 = vmatprep.subr.bf16.mxu1 %v2191_v1 }
0x1146   :  { %v1410_v56 = vpop.f32.mrb[20].mxu1 }
0x1147   :  { %v1419_v37 = vadd.f32 %v1410_v56, %v1368_v28  ;;  %v1412_v50 = vpop.f32.mrb[21].mxu1 }
0x1148   :  { %v2896_v27 = vadd.f32 %v1412_v50, %v1369_v47  ;;  %v1414_v29 = vpop.f32.mrb[22].mxu1  ;;  %v1902_v50 = vld [vmem:[#allocation8 + $0x18] sm:$0xff]  }
0x1149   :  { %v1421_v24 = vadd.f32 %v1414_v29, %v1370_v23  ;;  %v1416_v17 = vpop.f32.mrb[23].mxu1  ;;  %v1804_v7 = vmul.f32 -1.442695, %v1419_v37  ;;  %v1810_v23 = vld [vmem:[%s2984_s6] ss:$0 sm:$0xff]  ;;  %s2193_s6 = smov [#allocation10]  }
0x114a   :  { %2071 = vtanh.f32 %v2896_v27  ;;  %v2900_v48 = vadd.f32 %v1416_v17, %v1371_v5  ;;  %v1805_v15 = vmul.f32 -1.442695, %v2896_v27  ;;  %s1705_s4 = sshll.u32 %s2193_s6, 4  ;;  %s1706_s4 = int_to_ptr.vmem [resolvable:$true] %s1705_s4 }
0x114b   :  { %v1806_v8 = vmul.f32 -1.442695, %v1421_v24  ;;  %p2161_p3 = scmp.lt.s32.totalorder %s1706_s4, %s1706_s4 }
0x114c   :  { %2073 = vtanh.f32 %v2900_v48  ;;  %v1807_v14 = vmul.f32 -1.442695, %v2900_v48 }
0x114d   :  { %2075 = vpow2.f32 %v1804_v7 }
0x114e   :  { %2077 = vpow2.f32 %v1806_v8 }
0x1154   :  { %v2072_v21 = vpop.eup %2071 }
0x1155   :  { %1453 = vrot.lane.b32.xlu1 %v2072_v21, %s2188_s2 }
0x1156   :  { %v2074_v34 = vpop.eup %2073 }
0x1157   :  { %1455 = vrot.lane.b32.xlu0 %v2074_v34, %s2188_s2  ;;  %v2076_v35 = vpop.eup %2075 }
0x1158   :  { %v1435_v33 = vadd.f32 1.0, %v2076_v35  ;;  %v2078_v38 = vpop.eup %2077 }
0x1159   :  { %v1437_v25 = vadd.f32 1.0, %v2078_v38 }
0x115a   :  { %2079 = vrcp.f32 %v1435_v33 }
0x115b   :  { %2081 = vrcp.f32 %v1437_v25 }
0x1164   :  { %v2080_v10 = vpop.eup %2079 }
0x1165   :  { %v2082_v42 = vpop.eup %2081  ;;  %v1449_v6 = vmul.f32 %v2080_v10, %v1361_v0 }
0x1166   :  { %v1450_v58 = vmul.f32 %v2082_v42, %v1362_v54 }
0x11c7   :  { %v1454_v62 = vpop.permute.xlu1 %1453 }
0x11c8   :  { %v1459_v16 = vmul.f32 %v2080_v10, %v1454_v62 }
0x11c9   :  { %v1456_v3 = vpop.permute.xlu0 %1455 }
0x11ca   :  { %1463 = vrot.lane.b32.xlu1 %v1459_v16, %s2188_s2  ;;  %v1460_v43 = vmul.f32 %v2082_v42, %v1456_v3 }
0x11cc   :  { %1465 = vrot.lane.b32.xlu0 %v1460_v43, %s2188_s2 }
0x11ce   :  { %1490 = vperm.xlu1 %1869, %v1487_v36  }
0x11d0   :  { %1493 = vperm.xlu0 %1868, %v1488_v12  }
0x123c   :  { %v1464_v51 = vpop.permute.xlu1 %1463 }
0x123d   :  { %v1469_v46 = vadd.f32 %v1464_v51, %v1449_v6 }
0x123e   :  { %v1466_v19 = vpop.permute.xlu0 %1465 }
0x123f   :  { %2083 = vtanh.f32 %v1469_v46  ;;  %v1470_v13 = vadd.f32 %v1466_v19, %v1450_v58 }
0x1241   :  { %2085 = vtanh.f32 %v1470_v13 }
0x1242   :  { %2087 = vpow2.f32 %v1805_v15 }
0x1243   :  { %2089 = vpow2.f32 %v1807_v14 }
0x1249   :  { %v2084_v20 = vpop.eup %2083 }
0x124a   :  { %1475 = vrot.lane.b32.xlu1 %v2084_v20, %s2188_s2 }
0x124b   :  { %v2086_v2 = vpop.eup %2085 }
0x124c   :  { %1477 = vrot.lane.b32.xlu0 %v2086_v2, %s2188_s2  ;;  %v2088_v44 = vpop.eup %2087 }
0x124d   :  { %v1491_v59 = vpop.permute.xlu1 %1490  ;;  %v1436_v63 = vadd.f32 1.0, %v2088_v44  ;;  %v2090_v22 = vpop.eup %2089 }
0x124e   :  { %vm1495_vm4 = vcmp.eq.s32.totalorder %v1491_v59, 1  ;;  %v1438_v30 = vadd.f32 1.0, %v2090_v22 }
0x124f   :  { %v1499_v4 = vsel %vm1495_vm4, %v1469_v46, %v1361_v0  ;;  %v1494_v49 = vpop.permute.xlu0 %1493  ;;  %2091 = vrcp.f32 %v1436_v63 }
0x1250   :  { %1505 = vrot.lane.b32.xlu1 %v1499_v4, %s2188_s2  ;;  %vm1496_vm5 = vcmp.eq.s32.totalorder %v1494_v49, 1  ;;  %2093 = vrcp.f32 %v1438_v30 }
0x1251   :  { %v1500_v45 = vsel %vm1496_vm5, %v1470_v13, %v1362_v54 }
0x1252   :  { %1507 = vrot.lane.b32.xlu0 %v1500_v45, %s2188_s2 }
0x1259   :  { %v2092_v55 = vpop.eup %2091 }
0x125a   :  { %v2094_v61 = vpop.eup %2093 }
0x12bc   :  { %v1476_v60 = vpop.permute.xlu1 %1475 }
0x12bd   :  { %v1481_v31 = vmul.f32 %v2092_v55, %v1476_v60 }
0x12be   :  { %v1478_v39 = vpop.permute.xlu0 %1477 }
0x12bf   :  { %v1497_v32 = vsel %vm1495_vm4, %v1481_v31, %v2883_v40  ;;  %v1482_v11 = vmul.f32 %v2094_v61, %v1478_v39  ;;  %v1901_v40 = vld [vmem:[#allocation8 + $0x10] sm:$0xff]  }
0x12c0   :  { %1501 = vst.msk [vmem:[#allocation3] sm:$0xff] %vm66_vm0, %v1497_v32  ;;  %1851 = vmatpush3.bf16.msra.mxu1 %v1901_v40 }
0x12c1   :  { %v1498_v56 = vsel %vm1496_vm5, %v1482_v11, %v2888_v41  ;;  %1852 = vmatprep.subr.bf16.mxu1 %v2191_v1  ;;  %v1816_v1 = vld [vmem:[%s2986_s8] ss:$0 sm:$0xff]  ;;  %s2156_s8 = scalar_lea.vmem %s1706_s4, 256 }
0x12c2   :  { %v1506_v28 = vpop.permute.xlu1 %1505  ;;  %1502 = vst.msk [vmem:[#allocation3 + $0x8] sm:$0xff] %vm66_vm0, %v1498_v56  ;;  %v1516_v47 = vpack.c.bf16 %v1498_v56, %v1497_v32  ;;  %p2157_p2 = scmp.ne.s32.totalorder %s1706_s4, %s2156_s8  ;;  %p2162_p4 = scmp.lt.s32.totalorder %s2156_s8, %s2156_s8 }
0x12c3   :  { %1511 = vst.msk [vmem:[#allocation4] sm:$0xff] %vm66_vm0, %v1506_v28 }
0x12c4   :  { %v1508_v37 = vpop.permute.xlu0 %1507  ;;  %1843 = vmatmul.mubr.msk.bf16.vlgmr.msra.gmra.mrb[40].mxu0 %vm66_vm0, %v1516_v47  ;;  %1853 = vmatpush3.bf16.msra.mxu1 %v1902_v50  ;;  %p2163_p5 = por %p2162_p4, %p2161_p3 }
0x12c5   :  { %1512 = vst.msk [vmem:[#allocation4 + $0x8] sm:$0xff] %vm66_vm0, %v1508_v37 }
0x12c6   :  { %p2164_p6 = pnand %p2163_p5, %p2157_p2 }
0x1397   :  { %v1593_v27 = vpop.f32.mrb[40].mxu0 }
0x1398   :  { %v1594_v41 = vadd.f32 %v1810_v23, %v1593_v27  ;;  %v1844_v29 = vpop.f32.mrb[41].mxu0 }
0x1399   :  { %v1596_v5 = vpop.f32.mrb[42].mxu0 }
0x139a   :  { %v1597_v24 = vadd.f32 %v1810_v23, %v1596_v5  ;;  %v1845_v17 = vpop.f32.mrb[43].mxu0  ;;  %v1600_v48 = vmax.f32 %v1594_v41, 0.0 }
0x139c   :  { %v1601_v21 = vmax.f32 %v1597_v24, 0.0 }
0x139e   :  { %v1602_v34 = vpack.c.bf16 %v1601_v21, %v1600_v48 }
0x13a0   :  { %1855 = vmatmul.mubr.msk.bf16.vlgmr.msra.gmra.mrb[24].mxu1 %vm66_vm0, %v1602_v34 }
0x1473   :  { %v1679_v7 = vpop.f32.mrb[24].mxu1 }
0x1474   :  { %v1680_v8 = vadd.f32 %v1816_v1, %v1679_v7  ;;  %v1856_v35 = vpop.f32.mrb[25].mxu1 }
0x1475   :  { %v1682_v33 = vpop.f32.mrb[26].mxu1 }
0x1476   :  { %v1822_v38 = vmul.f32 -1.442695, %v1680_v8  ;;  %v1683_v25 = vadd.f32 %v1816_v1, %v1682_v33  ;;  %v1857_v10 = vpop.f32.mrb[27].mxu1 }
0x1478   :  { %2095 = vpow2.f32 %v1822_v38  ;;  %v1823_v62 = vmul.f32 -1.442695, %v1683_v25 }
0x147a   :  { %2097 = vpow2.f32 %v1823_v62 }
0x1482   :  { %v2096_v16 = vpop.eup %2095 }
0x1483   :  { %v1692_v36 = vadd.f32 1.0, %v2096_v16 }
0x1484   :  { %v2098_v42 = vpop.eup %2097 }
0x1485   :  { %2099 = vrcp.f32 %v1692_v36  ;;  %v1693_v3 = vadd.f32 1.0, %v2098_v42 }
0x1487   :  { %2101 = vrcp.f32 %v1693_v3 }
0x148f   :  { %v2100_v43 = vpop.eup %2099 }
0x1490   :  { %1698 = vst [vmem:[#allocation10] sm:$0xff] %v2100_v43 }
0x1491   :  { %v2102_v12 = vpop.eup %2101 }
0x1492   :  { %1699 = vst [vmem:[#allocation10 + $0x8] sm:$0xff] %v2102_v12 }
0x1493   :  { %2167 = shalt.err (!%p2164_p6)
}
0x1494   :  { %s2168_s16 = scalar_lea.hbm %s2987_s9, 256 }
0x1495   :  { %p2169_p7 = scmp.ne.s32.totalorder %s2987_s9, %s2168_s16  ;;  %p2172_p8 = scmp.lt.u32.totalorder %s2168_s16, %s2987_s9 }
0x1497   :  { %p2174_p9 = pnand %p2172_p8, %p2169_p7 }
0x1499   :  { %2177 = shalt.err (!%p2174_p9)
}
0x149a   :  { %1711 = dma.vmem_to_hbm [thread:$0]  %s1706_s4, 256, %s2987_s9, [#allocation7], %s2185_s19, %s2185_s19, %s2186_s20  }
0x149b   :  { %2182 = dma.done.wait [#allocation7], 256  }
0x149c   :  { %2183 = vsyncadd [#allocation7], 4294967040 }
0x149d   :  { %1715 = vsyncpa [#allocation6], 1 }
0x149e   :  { %1716 = vsyncpa [#allocation9], 1 }
0x149f   :  { %1717 = vsyncpa [#allocation7], 1 }

</bundles_post_ra>
